<compile_context>
chip_gen: v7x
topology: tpu7x:2x2x1
jax: 0.10.0
libtpu: 0.0.40
codegen_flags: <defaults>
</compile_context>

<pallas_src>
import functools
import math

import jax
import jax.numpy as jnp
from jax.experimental import pallas as pl
from jax.experimental.pallas import tpu as pltpu

STATE_DIM = 16
ACTION_DIM = 4
H1 = 400
H2 = 300
H1P = 512        # H1 zero-padded to a lane multiple of 128
H2P = 384        # H2 zero-padded to a lane multiple of 128
KP = 32          # (state+action)=20 zero-padded to 32 (bf16 sublane packing)
MAX_TILE_B = 512 # upper bound for the batch tile (sweepable)


def _default_bf16_epilogue():
    """bf16 bias/ReLU epilogue on chips with a bf16 VPU (v6e/v7x); f32 on v5e and older."""
    try:
        kind = jax.devices()[0].device_kind.lower()
    except Exception:
        return True
    return not any(t in kind for t in ("v2", "v3", "v4", "v5"))


def _pick_tile_b(batch, *, max_tile=MAX_TILE_B, align=128):
    """Largest batch tile <= max_tile, but keep >= 2 grid steps when the batch
    allows it so v7x's two TensorCores both get work (no-op on v5e/v6e)."""
    if batch >= 2 * max_tile:
        return max_tile
    half = -(-batch // 2)               # ceil(batch / 2)
    half = -(-half // align) * align    # round up to an aligned tile
    return max(align, min(max_tile, half))


def critic_kernel(xu_ref, w1_ref, b1_ref, w2_ref, b2_ref, w3_ref, b3_ref, out_ref,
                  *, bf16_epilogue):
    # Layer 1: [x,u] @ W1  (bf16 MXU inputs, f32 accumulate)
    acc1 = jnp.dot(xu_ref[...], w1_ref[...], preferred_element_type=jnp.float32)
    if bf16_epilogue:
        # Cast the accumulator down once; bias-add + ReLU in bf16 (packed VALU).
        h1 = jnp.maximum(acc1.astype(jnp.bfloat16) + b1_ref[...], 0.0)
    else:
        # v5e: f32 VPU epilogue, cast to bf16 only to feed the next MXU dot.
        h1 = jnp.maximum(acc1 + b1_ref[...], 0.0).astype(jnp.bfloat16)

    # Layer 2: h1 @ W2  (bf16 MXU inputs, f32 accumulate)
    acc2 = jnp.dot(h1, w2_ref[...], preferred_element_type=jnp.float32)
    if bf16_epilogue:
        h2 = jnp.maximum(acc2.astype(jnp.bfloat16) + b2_ref[...], 0.0)
    else:
        h2 = jnp.maximum(acc2 + b2_ref[...], 0.0)

    # Layer 3 (output width 1): VPU multiply + XLU lane-reduce, f32 result.
    # (h2 * w3 promotes to f32 when h2 is bf16.)
    q = jnp.sum(h2 * w3_ref[...], axis=-1, keepdims=True) + b3_ref[...]
    out_ref[...] = q.astype(out_ref.dtype)


def critic_forward(x, u, params, *, max_tile_b=MAX_TILE_B, bf16_epilogue=None):
    if bf16_epilogue is None:
        bf16_epilogue = _default_bf16_epilogue()
    (w1, b1, w2, b2, w3, b3) = params

    # Fuse the concat here (single K matmul) and cast to bf16 / pad K in the
    # wrapper so the kernel gets half-width activation DMAs with no per-tile cast.
    # TODO(synk): for very large training batches, pass x/u separately and split
    # the L1 dot in-kernel to avoid materializing the concatenated activations.
    xu = jnp.concatenate([x, u], axis=1)
    B, K = xu.shape
    kp = w1.shape[0]
    xu = jnp.pad(xu, ((0, 0), (0, kp - K))).astype(jnp.bfloat16)

    # Batch tiling: biggest tile that still leaves >=2 grid steps when possible.
    tile_b = _pick_tile_b(B, max_tile=max_tile_b)
    n_tiles = pl.cdiv(B, tile_b)
    Bp = n_tiles * tile_b
    if Bp != B:
        xu = jnp.pad(xu, ((0, Bp - B), (0, 0)))

    # Biases match the epilogue dtype (bf16 on v6e/v7x, f32 on v5e).
    b1k = b1.astype(jnp.bfloat16) if bf16_epilogue else b1
    b2k = b2.astype(jnp.bfloat16) if bf16_epilogue else b2

    resident = lambda i: (0, 0)   # weights/biases: same block every grid step

    out = pl.pallas_call(
        functools.partial(critic_kernel, bf16_epilogue=bf16_epilogue),
        out_shape=jax.ShapeDtypeStruct((Bp, 1), jnp.float32),
        grid=(n_tiles,),
        in_specs=[
            pl.BlockSpec((tile_b, kp), lambda i: (i, 0)),  # activations: batch-tiled (bf16)
            pl.BlockSpec((kp, H1P), resident),             # W1 (bf16)
            pl.BlockSpec((1, H1P), resident),              # b1
            pl.BlockSpec((H1P, H2P), resident),            # W2 (bf16)
            pl.BlockSpec((1, H2P), resident),              # b2
            pl.BlockSpec((1, H2P), resident),              # W3 row (f32)
            pl.BlockSpec((1, 1), resident),                # b3 (f32)
        ],
        out_specs=pl.BlockSpec((tile_b, 1), lambda i: (i, 0)),
        compiler_params=pltpu.CompilerParams(
            dimension_semantics=("parallel",),   # v7x: split batch tiles across TCs
            vmem_limit_bytes=32 << 20,
        ),
    )(xu, w1, b1k, w2, b2k, w3, b3)

    return out[:B]


def init_critic_params(key, state_dim, action_dim):
    """PyTorch nn.Linear default init: U(-1/sqrt(fan_in), 1/sqrt(fan_in)).
    Weights stored as [in, out]; K / hidden dims zero-padded to packing / lane
    multiples; W1/W2 cast to bf16 (dots still accumulate in f32)."""
    k1, k2, k3, k4, k5, k6 = jax.random.split(key, 6)
    fan1 = state_dim + action_dim
    bnd1 = 1.0 / math.sqrt(fan1)
    w1 = jax.random.uniform(k1, (fan1, H1), jnp.float32, -bnd1, bnd1)
    b1 = jax.random.uniform(k2, (1, H1), jnp.float32, -bnd1, bnd1)

    bnd2 = 1.0 / math.sqrt(H1)
    w2 = jax.random.uniform(k3, (H1, H2), jnp.float32, -bnd2, bnd2)
    b2 = jax.random.uniform(k4, (1, H2), jnp.float32, -bnd2, bnd2)

    bnd3 = 1.0 / math.sqrt(H2)
    w3 = jax.random.uniform(k5, (1, H2), jnp.float32, -bnd3, bnd3)   # layer3 weight row
    b3 = jax.random.uniform(k6, (1, 1), jnp.float32, -bnd3, bnd3)

    # Zero-pad K (20->32) and hidden dims (400->512, 300->384); padded rows /
    # columns are exact zeros so the math is unchanged.
    w1p = jnp.pad(w1, ((0, KP - fan1), (0, H1P - H1))).astype(jnp.bfloat16)
    b1p = jnp.pad(b1, ((0, 0), (0, H1P - H1)))
    w2p = jnp.pad(w2, ((0, H1P - H1), (0, H2P - H2))).astype(jnp.bfloat16)
    b2p = jnp.pad(b2, ((0, 0), (0, H2P - H2)))
    w3p = jnp.pad(w3, ((0, 0), (0, H2P - H2)))
    return (w1p, b1p, w2p, b2p, w3p, b3)


if __name__ == "__main__":
    key = jax.random.PRNGKey(0)
    kx, ku, kp = jax.random.split(key, 3)

    B = 256   # -> two 128-row batch tiles: exercises the grid and v7x megacore split
    x = jax.random.normal(kx, (B, STATE_DIM), jnp.float32)   # state
    u = jax.random.normal(ku, (B, ACTION_DIM), jnp.float32)  # action

    params = init_critic_params(kp, STATE_DIM, ACTION_DIM)
    bf16_ep = _default_bf16_epilogue()

    q = critic_forward(x, u, params, bf16_epilogue=bf16_ep)
    jax.block_until_ready(q)

    # Reference: identical math in plain JAX (same bf16 weights / same epilogue dtype).
    (w1, b1, w2, b2, w3, b3) = params
    xu = jnp.concatenate([x, u], axis=1)
    xu_b = jnp.pad(xu, ((0, 0), (0, w1.shape[0] - xu.shape[1]))).astype(jnp.bfloat16)
    acc1 = jnp.dot(xu_b, w1, preferred_element_type=jnp.float32)
    if bf16_ep:
        h1 = jnp.maximum(acc1.astype(jnp.bfloat16) + b1.astype(jnp.bfloat16), 0.0)
        acc2 = jnp.dot(h1, w2, preferred_element_type=jnp.float32)
        h2 = jnp.maximum(acc2.astype(jnp.bfloat16) + b2.astype(jnp.bfloat16), 0.0)
    else:
        h1 = jnp.maximum(acc1 + b1, 0.0).astype(jnp.bfloat16)
        acc2 = jnp.dot(h1, w2, preferred_element_type=jnp.float32)
        h2 = jnp.maximum(acc2 + b2, 0.0)
    q_ref = jnp.sum(h2 * w3, axis=-1, keepdims=True) + b3

    assert q.shape == (B, 1)
    assert jnp.allclose(q, q_ref, atol=2e-2, rtol=2e-2), \
        float(jnp.max(jnp.abs(q - q_ref)))

    print("KERNEL_OK")
</pallas_src>

<mosaic_0001>
module attributes {stable_mosaic.version = 11 : i64} {
  func.func @critic_kernel(%arg0: i32, %arg1: memref<128x32xbf16, #tpu.memory_space<vmem>>, %arg2: memref<32x512xbf16, #tpu.memory_space<vmem>>, %arg3: memref<1x512xbf16, #tpu.memory_space<vmem>>, %arg4: memref<512x384xbf16, #tpu.memory_space<vmem>>, %arg5: memref<1x384xbf16, #tpu.memory_space<vmem>>, %arg6: memref<1x384xf32, #tpu.memory_space<vmem>>, %arg7: memref<1x1xf32, #tpu.memory_space<vmem>>, %arg8: memref<128x1xf32, #tpu.memory_space<vmem>>) attributes {dimension_semantics = [#tpu.dimension_semantics<parallel>], iteration_bounds = array<i64: 2>, scalar_prefetch = 0 : i64, scratch_operands = 0 : i64, tpu.core_type = #tpu.core_type<tc>, window_params = [{transform_indices = @transform_0, window_bounds = array<i64: 128, 32>}, {pipeline_mode = #tpu.pipeline_mode<synchronous>, transform_indices = @transform_1, window_bounds = array<i64: 32, 512>}, {pipeline_mode = #tpu.pipeline_mode<synchronous>, transform_indices = @transform_2, window_bounds = array<i64: 1, 512>}, {pipeline_mode = #tpu.pipeline_mode<synchronous>, transform_indices = @transform_3, window_bounds = array<i64: 512, 384>}, {pipeline_mode = #tpu.pipeline_mode<synchronous>, transform_indices = @transform_4, window_bounds = array<i64: 1, 384>}, {pipeline_mode = #tpu.pipeline_mode<synchronous>, transform_indices = @transform_5, window_bounds = array<i64: 1, 384>}, {pipeline_mode = #tpu.pipeline_mode<synchronous>, transform_indices = @transform_6, window_bounds = array<i64: 1, 1>}, {transform_indices = @transform_7, window_bounds = array<i64: 128, 1>}]} {
    %c0 = arith.constant 0 : index
    %c0_0 = arith.constant 0 : index
    %0 = vector.load %arg1[%c0, %c0_0] : memref<128x32xbf16, #tpu.memory_space<vmem>>, vector<128x32xbf16>
    %c0_1 = arith.constant 0 : index
    %c0_2 = arith.constant 0 : index
    %1 = vector.load %arg2[%c0_1, %c0_2] : memref<32x512xbf16, #tpu.memory_space<vmem>>, vector<32x512xbf16>
    %cst = arith.constant dense<0.000000e+00> : vector<128x512xf32>
    %2 = tpu.matmul %0, %1, %cst {dimension_numbers = #tpu.dot_dimension_numbers<[1], [0], [0], [1], [0, 0, 1, 1], [], []>} : vector<128x32xbf16>, vector<32x512xbf16>, vector<128x512xf32> -> vector<128x512xf32>
    %3 = arith.truncf %2 : vector<128x512xf32> to vector<128x512xbf16>
    %c0_3 = arith.constant 0 : index
    %c0_4 = arith.constant 0 : index
    %4 = vector.load %arg3[%c0_3, %c0_4] : memref<1x512xbf16, #tpu.memory_space<vmem>>, vector<1x512xbf16>
    %5 = vector.broadcast %4 : vector<1x512xbf16> to vector<128x512xbf16>
    %6 = arith.addf %3, %5 : vector<128x512xbf16>
    %cst_5 = arith.constant 0.000000e+00 : bf16
    %7 = vector.broadcast %cst_5 : bf16 to vector<128x512xbf16>
    %8 = arith.maximumf %6, %7 : vector<128x512xbf16>
    %c0_6 = arith.constant 0 : index
    %c0_7 = arith.constant 0 : index
    %9 = vector.load %arg4[%c0_6, %c0_7] : memref<512x384xbf16, #tpu.memory_space<vmem>>, vector<512x384xbf16>
    %cst_8 = arith.constant dense<0.000000e+00> : vector<128x384xf32>
    %10 = tpu.matmul %8, %9, %cst_8 {dimension_numbers = #tpu.dot_dimension_numbers<[1], [0], [0], [1], [0, 0, 1, 1], [], []>} : vector<128x512xbf16>, vector<512x384xbf16>, vector<128x384xf32> -> vector<128x384xf32>
    %11 = arith.truncf %10 : vector<128x384xf32> to vector<128x384xbf16>
    %c0_9 = arith.constant 0 : index
    %c0_10 = arith.constant 0 : index
    %12 = vector.load %arg5[%c0_9, %c0_10] : memref<1x384xbf16, #tpu.memory_space<vmem>>, vector<1x384xbf16>
    %13 = vector.broadcast %12 : vector<1x384xbf16> to vector<128x384xbf16>
    %14 = arith.addf %11, %13 : vector<128x384xbf16>
    %cst_11 = arith.constant 0.000000e+00 : bf16
    %15 = vector.broadcast %cst_11 : bf16 to vector<128x384xbf16>
    %16 = arith.maximumf %14, %15 : vector<128x384xbf16>
    %c0_12 = arith.constant 0 : index
    %c0_13 = arith.constant 0 : index
    %17 = vector.load %arg6[%c0_12, %c0_13] : memref<1x384xf32, #tpu.memory_space<vmem>>, vector<1x384xf32>
    %18 = arith.extf %16 : vector<128x384xbf16> to vector<128x384xf32>
    %19 = vector.broadcast %17 : vector<1x384xf32> to vector<128x384xf32>
    %20 = arith.mulf %18, %19 : vector<128x384xf32>
    %cst_14 = arith.constant dense<0.000000e+00> : vector<128xf32>
    %21 = vector.multi_reduction <add>, %20, %cst_14 [1] : vector<128x384xf32> to vector<128xf32>
    %22 = vector.shape_cast %21 : vector<128xf32> to vector<128x1xf32>
    %c0_15 = arith.constant 0 : index
    %c0_16 = arith.constant 0 : index
    %23 = vector.load %arg7[%c0_15, %c0_16] : memref<1x1xf32, #tpu.memory_space<vmem>>, vector<1x1xf32>
    %24 = vector.broadcast %23 : vector<1x1xf32> to vector<128x1xf32>
    %25 = arith.addf %22, %24 : vector<128x1xf32>
    %c0_17 = arith.constant 0 : index
    %c0_18 = arith.constant 0 : index
    %26 = vector.load %arg8[%c0_17, %c0_18] : memref<128x1xf32, #tpu.memory_space<vmem>>, vector<128x1xf32>
    tpu.vector_store %arg8[%c0_17, %c0_18], %25 {strides = array<i32>} : memref<128x1xf32, #tpu.memory_space<vmem>>, vector<128x1xf32>,
    return
  }
  func.func @transform_0(%arg0: i32) -> (i32, i32) {
    %c0_i32 = arith.constant 0 : i32
    %c0_i32_0 = arith.constant 0 : i32
    return %arg0, %c0_i32 : i32, i32
  }
  func.func @transform_1(%arg0: i32) -> (i32, i32) {
    %c0_i32 = arith.constant 0 : i32
    %c0_i32_0 = arith.constant 0 : i32
    %c0_i32_1 = arith.constant 0 : i32
    return %c0_i32, %c0_i32_0 : i32, i32
  }
  func.func @transform_2(%arg0: i32) -> (i32, i32) {
    %c0_i32 = arith.constant 0 : i32
    %c0_i32_0 = arith.constant 0 : i32
    %c0_i32_1 = arith.constant 0 : i32
    return %c0_i32, %c0_i32_0 : i32, i32
  }
  func.func @transform_3(%arg0: i32) -> (i32, i32) {
    %c0_i32 = arith.constant 0 : i32
    %c0_i32_0 = arith.constant 0 : i32
    %c0_i32_1 = arith.constant 0 : i32
    return %c0_i32, %c0_i32_0 : i32, i32
  }
  func.func @transform_4(%arg0: i32) -> (i32, i32) {
    %c0_i32 = arith.constant 0 : i32
    %c0_i32_0 = arith.constant 0 : i32
    %c0_i32_1 = arith.constant 0 : i32
    return %c0_i32, %c0_i32_0 : i32, i32
  }
  func.func @transform_5(%arg0: i32) -> (i32, i32) {
    %c0_i32 = arith.constant 0 : i32
    %c0_i32_0 = arith.constant 0 : i32
    %c0_i32_1 = arith.constant 0 : i32
    return %c0_i32, %c0_i32_0 : i32, i32
  }
  func.func @transform_6(%arg0: i32) -> (i32, i32) {
    %c0_i32 = arith.constant 0 : i32
    %c0_i32_0 = arith.constant 0 : i32
    %c0_i32_1 = arith.constant 0 : i32
    return %c0_i32, %c0_i32_0 : i32, i32
  }
  func.func @transform_7(%arg0: i32) -> (i32, i32) {
    %c0_i32 = arith.constant 0 : i32
    %c0_i32_0 = arith.constant 0 : i32
    return %arg0, %c0_i32 : i32, i32
  }
}

</mosaic_0001>

<bundles_post_ra>
// kernel: tpu_custom_call.1
= control target key start
LH: loop header
LB: loop body
LE: loop exit
PB: predicated region body
PF: predicated region fallthrough
CT: control target
= control target key end

     0   :  { %s3397_s0 = inlined_call_operand.vmem [shape: bf16[256,32], index: 0, kind: input, shape index: {}]   ;;  %s3398_s1 = inlined_call_operand.vmem [shape: bf16[32,512], index: 1, kind: input, shape index: {}]   ;;  %s3399_s2 = inlined_call_operand.vmem [shape: bf16[1,512], index: 2, kind: input, shape index: {}]   ;;  %s3400_s3 = inlined_call_operand.hbm [shape: bf16[512,384], index: 3, kind: input, shape index: {}]   ;;  %s3401_s4 = inlined_call_operand.vmem [shape: bf16[1,384], index: 4, kind: input, shape index: {}]   ;;  %s3402_s5 = inlined_call_operand.vmem [shape: f32[1,384], index: 5, kind: input, shape index: {}]   ;;  %s3403_s6 = inlined_call_operand.<no memory space> [shape: f32[1,1], index: 6, kind: input, shape index: {}]   ;;  %s3404_s7 = inlined_call_operand.vmem [shape: f32[256,1], index: 7, kind: output, shape index: {}]  }
   0x1   :  { %v12_v0 = vstv %s3403_s6 }
   0x2   :  { %13 = vst [vmem:[#allocation2] sm:$0x1] %v12_v0 }
   0x3   :  { %14 = vsyncpa [#allocation4], 0  ;;  %s2831_s26 = smov 0  }
   0x4 LB: > { %s2268_s27 = sadd.s32 4294967295, %s2781_s26   ;;  %p2270_p0 = scmp.ge.s32.totalorder %s2781_s26, 1  ;;  %s2781_s26 = sphi %s2831_s26, %s20_s26  }
   0x5   : > { %p203_p1 = scmp.lt.s32.totalorder %s2781_s26, 3  ;;  %s2783_s28 = smov [#allocation3]  }
   0x6   : > { %s221_s29 = sshll.u32 %s2783_s28, 4  ;;  %p2845_p3 = scmp.eq.s32.totalorder %s2268_s27, 0  ;;  %s222_s29 = int_to_ptr.vmem [resolvable:$true] %s221_s29 }
   0x7   : > { %p2839_p2 = pnand %p2270_p0, %p203_p1  ;;  %s2743_s11 = scalar_lea.hbm %s3400_s3, 12288 }
   0x8   : > { %s3409_s30 = scalar_select %p2845_p3, 1, 0 }
   0x9   : > { %s3408_s6 = scalar_select %p2839_p2, 1, 0 }
   0xa   : > { %p2576_p4 = pneg %p2839_p2  ;;  %p2744_p6 = scmp.ne.s32.totalorder %s3400_s3, %s2743_s11 }
   0xb   : > { %p2750_p10 = scmp.lt.u32.totalorder %s2743_s11, %s3400_s3 }
   0xc   : > { %p2853_p5 = pnand %p2845_p3, %p2576_p4 }
   0xe   : > { %p2745_p7 = pneg %p2853_p5 }
  0x10   : > { %p2746_p8 = pnand %p2745_p7, %p2744_p6 }
  0x12   : > { %p2747_p9 = pneg %p2746_p8 }
  0x14   : > { %p2752_p11 = pnand %p2750_p10, %p2747_p9 }
  0x16   : > { %2755 = shalt.err (!%p2752_p11)
}
  0x17   : > { %s2756_s16 = scalar_lea.vmem %s222_s29, 12288  ;;  %p2764_p1 = scmp.lt.s32.totalorder %s222_s29, %s222_s29 }
  0x18   : > { %p2757_p12 = scmp.ne.s32.totalorder %s222_s29, %s2756_s16  ;;  %p2765_p4 = scmp.lt.s32.totalorder %s2756_s16, %s2756_s16 }
  0x1a   : > { %p2759_p13 = pnand %p2757_p12, %p2745_p7  ;;  %p2766_p3 = por %p2765_p4, %p2764_p1 }
  0x1c   : > { %p2760_p0 = pneg %p2759_p13 }
  0x1e   : > { %p2767_p2 = pnand %p2766_p3, %p2760_p0 }
  0x20   : > { %2770 = shalt.err (!%p2767_p2)
}
  0x21   : > { %s2784_s17 = smov 192   ;;  %s2785_s18 = smov 12  }
  0x22   : > { %2579 = dma.hbm_to_vmem [thread:$0]  (!%p2853_p5), %s3400_s3, 12288, %s222_s29, [#allocation4], %s2784_s17, %s2784_s17, %s2785_s18  }
  0x23   : > { %p3411_p6 = scmp.ne.s32.totalorder %s3408_s6, 0 }
  0x24   : > { %p3412_p8 = scmp.ne.s32.totalorder (!%p3411_p6), %s3409_s30, 0 }
  0x25   : > { %255 = sbr.rel (%p3411_p6) target bundleno = 773 (0x305), region = 48 }
  0x2c   : > { %2776 = dma.done.wait (%p3412_p8), [#allocation4], 12288  }
  0x2d   : > { %2778 = vsyncadd (%p3412_p8), [#allocation4], 4294955008  ;;  %s2275_s21 = sshll.u32 %s2268_s27, 4  ;;  %v2786_v1 = vmov 0   ;;  %v2595_v2 = vld [vmem:[%s3398_s1 + $0x4] ss:$16 sps:$4 sm:$0xff]  }
  0x2e   : > { %461 = vmatprep.mubr.bf16.mxu0 %v2786_v1  ;;  %p288_p2 = scmp.lt.s32.totalorder %s2275_s21, 31  ;;  %574 = vmatprep.mubr.bf16.mxu1 %v2786_v1  ;;  %v2597_v3 = vld [vmem:[%s3398_s1] ss:$16 sps:$4 sm:$0xff]   ;;  %v2598_v4 = vld [vmem:[%s3398_s1 + $0x24] ss:$16 sps:$4 sm:$0xff]   ;;  %vm404_vm0 = vcmask 261120  }
  0x2f   : > { %429 = vmatprep.subr.bf16.mxu0 %v2595_v2  ;;  %v2600_v5 = vld [vmem:[%s3398_s1 + $0x20] ss:$16 sps:$4 sm:$0xff]   ;;  %v2608_v7 = vld [vmem:[%s3398_s1 + $0xc] ss:$16 sps:$4 sm:$0xff]   ;;  %v2610_v8 = vld [vmem:[%s3398_s1 + $0x8] ss:$16 sps:$4 sm:$0xff]  }
  0x30   : > { %s3414_s21 = smov (!%p288_p2, %s2275_s21), 31  ;;  %430 = vmatpush1.bf16.msra.mxu0 %v2597_v3  ;;  %542 = vmatprep.subr.bf16.mxu1 %v2608_v7  ;;  %v2612_v10 = vld [vmem:[%s3398_s1 + $0x2c] ss:$16 sps:$4 sm:$0xff]   ;;  %v2614_v11 = vld [vmem:[%s3398_s1 + $0x28] ss:$16 sps:$4 sm:$0xff]   ;;  %v700_v7 = vlaneseq  ;;  %vm2183_vm1 = vcmask 7168  }
  0x31   : > { %s2276_s22 = sshll.u32 %s3414_s21, 2  ;;  %431 = vmatprep.subr.bf16.mxu0 %v2598_v4  ;;  %543 = vmatpush1.bf16.msra.mxu1 %v2610_v8  ;;  %v2615_v12 = vld [vmem:[#allocation3 + $0xc8] ss:$12 sps:$4 sm:$0xff]   ;;  %v2616_v13 = vld [vmem:[#allocation3] ss:$12 sps:$4 sm:$0xff]   ;;  %s2278_s28 = sshll.u32 %s3414_s21, 3 }
  0x32   : > { %s2895_s6 = scalar_lea.vmem %s3397_s0, %s2276_s22  ;;  %544 = vmatprep.subr.bf16.mxu1 %v2612_v10  ;;  %v2618_v14 = vld [vmem:[#allocation3 + $0x4] ss:$12 sps:$4 sm:$0xff]   ;;  %v2619_v15 = vld [vmem:[#allocation3 + $0x8] ss:$12 sps:$4 sm:$0xff]   ;;  %v2623_v17 = vld [vmem:[#allocation3 + $0xe0] ss:$12 sps:$4 sm:$0xff]  }
  0x33   : > { %v2601_v6 = vld [vmem:[%s2895_s6] sm:$0xff]   ;;  %v2602_v9 = vld [vmem:[%s2895_s6 + $0x8] sm:$0xff]   ;;  %v2603_v21 = vld [vmem:[%s2895_s6 + $0x10] sm:$0xff]  }
  0x34   : > { %432 = vmatpush1.bf16.msra.mxu0 %v2600_v5  ;;  %v2622_v16 = vld [vmem:[#allocation3 + $0x1c] ss:$12 sps:$4 sm:$0xff]   ;;  %v2620_v18 = vld [vmem:[#allocation3 + $0x18] ss:$12 sps:$4 sm:$0xff]   ;;  %v2626_v19 = vld [vmem:[#allocation3 + $0x34] ss:$12 sps:$4 sm:$0xff]  }
  0x35   : > { %545 = vmatpush1.bf16.msra.mxu1 %v2614_v11  ;;  %1445 = vmatprep.subr.bf16.mxu0 %v2618_v14  ;;  %v2627_v20 = vld [vmem:[#allocation3 + $0x20] ss:$12 sps:$4 sm:$0xff]   ;;  %v2624_v22 = vld [vmem:[#allocation3 + $0x30] ss:$12 sps:$4 sm:$0xff]   ;;  %v2631_v23 = vld [vmem:[#allocation3 + $0xf8] ss:$12 sps:$4 sm:$0xff]  }
  0x36   : > { %2412 = vmatprep.subr.bf16.mxu1 %v2615_v12  ;;  %v2630_v24 = vld [vmem:[#allocation3 + $0x4c] ss:$12 sps:$4 sm:$0xff]   ;;  %v2628_v26 = vld [vmem:[#allocation3 + $0x48] ss:$12 sps:$4 sm:$0xff]   ;;  %v2634_v27 = vld [vmem:[#allocation3 + $0x64] ss:$12 sps:$4 sm:$0xff]  }
  0x37   : > { %2295 = vmatmul.mubr.msk.bf16.vlgmr.msra.gmra.mrb[0].mxu0 %vm404_vm0, %v2601_v6  ;;  %v2635_v25 = vld [vmem:[#allocation3 + $0x38] ss:$12 sps:$4 sm:$0xff]   ;;  %v2639_v28 = vld [vmem:[#allocation3 + $0x110] ss:$12 sps:$4 sm:$0xff]   ;;  %v2632_v31 = vld [vmem:[#allocation3 + $0x60] ss:$12 sps:$4 sm:$0xff]  }
  0x38   : > { %471 = vmatprep.mubr.bf16.mxu0 %v2786_v1  ;;  %1446 = vmatpush1.bf16.msra.mxu0 %v2616_v13  ;;  %v2604_v29 = vld [vmem:[%s2895_s6 + $0x18] sm:$0xff]   ;;  %v2655_v37 = vld [vmem:[#allocation3 + $0x140] ss:$12 sps:$4 sm:$0xff]   ;;  %v2650_v44 = vld [vmem:[#allocation3 + $0xc4] ss:$12 sps:$4 sm:$0xff]  }
  0x39   : > { %2303 = vmatmul.mubr.msk.bf16.vlgmr.msra.gmra.mrb[0].mxu1 %vm404_vm0, %v2601_v6  ;;  %1447 = vmatprep.subr.bf16.mxu0 %v2622_v16  ;;  %v2643_v30 = vld [vmem:[#allocation3 + $0x50] ss:$12 sps:$4 sm:$0xff]   ;;  %v2647_v33 = vld [vmem:[#allocation3 + $0x128] ss:$12 sps:$4 sm:$0xff]   ;;  %v2636_v34 = vld [vmem:[#allocation3 + $0x78] ss:$12 sps:$4 sm:$0xff]  }
  0x3a   : > { %584 = vmatprep.mubr.bf16.mxu1 %v2786_v1  ;;  %2413 = vmatpush3.bf16.msra.mxu1 %v2619_v15  ;;  %v2638_v32 = vld [vmem:[#allocation3 + $0x7c] ss:$12 sps:$4 sm:$0xff]   ;;  %v2642_v36 = vld [vmem:[#allocation3 + $0x94] ss:$12 sps:$4 sm:$0xff]   ;;  %v2646_v41 = vld [vmem:[#allocation3 + $0xac] ss:$12 sps:$4 sm:$0xff]  }
  0x3b   : > { %2414 = vmatprep.subr.bf16.mxu1 %v2623_v17  ;;  %v2651_v35 = vld [vmem:[#allocation3 + $0x68] ss:$12 sps:$4 sm:$0xff]   ;;  %v2605_v38 = vld [vmem:[%s2895_s6 + $0x20] sm:$0xff]   ;;  %v2662_v53 = vld [vmem:[#allocation3 + $0x10c] ss:$12 sps:$4 sm:$0xff]  }
  0x3c   : > { %1448 = vmatpush1.bf16.msra.mxu0 %v2620_v18  ;;  %v2640_v39 = vld [vmem:[#allocation3 + $0x90] ss:$12 sps:$4 sm:$0xff]   ;;  %v2659_v40 = vld [vmem:[#allocation3 + $0x80] ss:$12 sps:$4 sm:$0xff]   ;;  %v2663_v42 = vld [vmem:[#allocation3 + $0x158] ss:$12 sps:$4 sm:$0xff]  }
  0x3d   : > { %1449 = vmatprep.subr.bf16.mxu0 %v2626_v19  ;;  %v2644_v43 = vld [vmem:[#allocation3 + $0xa8] ss:$12 sps:$4 sm:$0xff]   ;;  %v2667_v45 = vld [vmem:[#allocation3 + $0x98] ss:$12 sps:$4 sm:$0xff]   ;;  %v2648_v47 = vld [vmem:[#allocation3 + $0xc0] ss:$12 sps:$4 sm:$0xff]  }
  0x3e   : > { %2415 = vmatpush3.bf16.msra.mxu1 %v2627_v20  ;;  %v2606_v46 = vld [vmem:[%s2895_s6 + $0x28] sm:$0xff]   ;;  %v2658_v50 = vld [vmem:[#allocation3 + $0xf4] ss:$12 sps:$4 sm:$0xff]   ;;  %v2656_v52 = vld [vmem:[#allocation3 + $0xf0] ss:$12 sps:$4 sm:$0xff]  }
  0x3f   : > { %2296 = vmatmul.mubr.msk.bf16.gmra.mrb[4].mxu0 %vm404_vm0, %v2602_v9  ;;  %2416 = vmatprep.subr.bf16.mxu1 %v2631_v23  ;;  %v2654_v48 = vld [vmem:[#allocation3 + $0xdc] ss:$12 sps:$4 sm:$0xff]   ;;  %v2652_v49 = vld [vmem:[#allocation3 + $0xd8] ss:$12 sps:$4 sm:$0xff]   ;;  %v2607_v51 = vld [vmem:[%s2895_s6 + $0x30] sm:$0xff]  }
  0x40   : > { %481 = vmatprep.mubr.bf16.mxu0 %v2786_v1  ;;  %1450 = vmatpush1.bf16.msra.mxu0 %v2624_v22  ;;  %v2660_v54 = vld [vmem:[#allocation3 + $0x108] ss:$12 sps:$4 sm:$0xff]   ;;  %v2666_v55 = vld [vmem:[#allocation3 + $0x124] ss:$12 sps:$4 sm:$0xff]   ;;  %v2664_v57 = vld [vmem:[#allocation3 + $0x120] ss:$12 sps:$4 sm:$0xff]  }
  0x41   : > { %2304 = vmatmul.mubr.msk.bf16.gmra.mrb[4].mxu1 %vm404_vm0, %v2602_v9  ;;  %1451 = vmatprep.subr.bf16.mxu0 %v2630_v24  ;;  %v2611_v56 = vld [vmem:[%s2895_s6 + $0x38] sm:$0xff]   ;;  %v2682_v3 = vld [vmem:[#allocation3 + $0x184] ss:$12 sps:$4 sm:$0xff]   ;;  %v2787_v5 = vmov 1966171168   ;;  %v2953_v9 = vshrl.u32 %v700_v7, 7  ;;  %s3360_s6 = scalar_lea.vmem %s3404_s7, %s2278_s28 }
  0x42   : > { %594 = vmatprep.mubr.bf16.mxu1 %v2786_v1  ;;  %2417 = vmatpush3.bf16.msra.mxu1 %v2635_v25  ;;  %v2670_v58 = vld [vmem:[#allocation3 + $0x13c] ss:$12 sps:$4 sm:$0xff]   ;;  %v2668_v59 = vld [vmem:[#allocation3 + $0x138] ss:$12 sps:$4 sm:$0xff]   ;;  %v2674_v60 = vld [vmem:[#allocation3 + $0x154] ss:$12 sps:$4 sm:$0xff]   ;;  %v698_v6 = vunpack.c.l.s4 %v2787_v5 }
  0x43   : > { %2418 = vmatprep.subr.bf16.mxu1 %v2639_v28  ;;  %v2672_v61 = vld [vmem:[#allocation3 + $0x150] ss:$12 sps:$4 sm:$0xff]   ;;  %v2678_v63 = vld [vmem:[#allocation3 + $0x16c] ss:$12 sps:$4 sm:$0xff]   ;;  %v2676_v2 = vld [vmem:[#allocation3 + $0x168] ss:$12 sps:$4 sm:$0xff]  }
  0x44   : > { %1452 = vmatpush1.bf16.msra.mxu0 %v2628_v26  ;;  %v2671_v62 = vld [vmem:[#allocation3 + $0x170] ss:$12 sps:$4 sm:$0xff]   ;;  %v2679_v4 = vld [vmem:[#allocation3 + $0x248] ss:$12 sps:$4 sm:$0xff]   ;;  %v699_v8 = vunpack.c.0.s8 %v698_v6  ;;  %v2970_v16 = vsub.s32 0, %v2953_v9 }
  0x45   : > { %1453 = vmatprep.subr.bf16.mxu0 %v2634_v27  ;;  %v2675_v0 = vld [vmem:[#allocation3 + $0xb0] ss:$12 sps:$4 sm:$0xff]  }
  0x46   : > { %2419 = vmatpush3.bf16.msra.mxu1 %v2643_v30  ;;  %v2311_v10 = vld.sshfl [vmem:[%s3399_s2] sm:$0x33 pattern:$0x75316420]  ;;  %v2959_v11 = vsub.s32 %v699_v8, %v2953_v9  ;;  %v2698_v7 = vld [vmem:[#allocation3 + $0x1e4] ss:$12 sps:$4 sm:$0xff]  }
  0x47   : > { %2297 = vmatmul.mubr.msk.bf16.gmra.mrb[8].mxu0 %vm404_vm0, %v2603_v21  ;;  %2420 = vmatprep.subr.bf16.mxu1 %v2647_v33  ;;  %v696_v12 = vcombine.high %v2311_v10, %v2311_v10  ;;  %v2680_v30 = vld [vmem:[#allocation3 + $0x180] ss:$12 sps:$4 sm:$0xff]   ;;  %v2711_v8 = vld [vmem:[#allocation3 + $0x2a8] ss:$12 sps:$4 sm:$0xff]  }
  0x48   : > { %491 = vmatprep.mubr.bf16.mxu0 %v2786_v1  ;;  %1454 = vmatpush1.bf16.msra.mxu0 %v2632_v31  ;;  %v2962_v13 = vrot.slane %v2311_v10, %v2959_v11  ;;  %v2683_v31 = vld [vmem:[#allocation3 + $0x188] ss:$12 sps:$4 sm:$0xff]  }
  0x49   : > { %2305 = vmatmul.mubr.msk.bf16.gmra.mrb[8].mxu1 %vm404_vm0, %v2603_v21  ;;  %1455 = vmatprep.subr.bf16.mxu0 %v2638_v32  ;;  %v2965_v14 = vrot.slane %v696_v12, %v2959_v11 }
  0x4a   : > { %604 = vmatprep.mubr.bf16.mxu1 %v2786_v1  ;;  %2421 = vmatpush3.bf16.msra.mxu1 %v2651_v35  ;;  %v714_v15 = vpack.i.b16 %v2962_v13, %v2962_v13  ;;  %v2687_v35 = vld [vmem:[#allocation3 + $0x260] ss:$12 sps:$4 sm:$0xff]  }
  0x4b   : > { %2422 = vmatprep.subr.bf16.mxu1 %v2655_v37  ;;  %v721_v17 = vpack.i.b16 %v2965_v14, %v2965_v14 }
  0x4c   : > { %1456 = vmatpush1.bf16.msra.mxu0 %v2636_v34  ;;  %v2975_v20 = vrot.slane %v714_v15, %v2970_v16  ;;  %v2686_v34 = vld [vmem:[#allocation3 + $0x19c] ss:$12 sps:$4 sm:$0xff]  }
  0x4d   : > { %1457 = vmatprep.subr.bf16.mxu0 %v2642_v36  ;;  %v2978_v22 = vrot.slane %v721_v17, %v2970_v16 }
  0x4e   : > { %2423 = vmatpush3.bf16.msra.mxu1 %v2659_v40 }
  0x4f   : > { %2298 = vmatmul.mubr.msk.bf16.gmra.mrb[12].mxu0 %vm404_vm0, %v2604_v29  ;;  %2424 = vmatprep.subr.bf16.mxu1 %v2663_v42  ;;  %v2684_v42 = vld [vmem:[#allocation3 + $0x198] ss:$12 sps:$4 sm:$0xff]  }
  0x50   : > { %501 = vmatprep.mubr.bf16.mxu0 %v2786_v1  ;;  %1458 = vmatpush1.bf16.msra.mxu0 %v2640_v39 }
  0x51   : > { %2306 = vmatmul.mubr.msk.bf16.gmra.mrb[12].mxu1 %vm404_vm0, %v2604_v29  ;;  %1459 = vmatprep.subr.bf16.mxu0 %v2646_v41 }
  0x52   : > { %614 = vmatprep.mubr.bf16.mxu1 %v2786_v1  ;;  %2425 = vmatpush3.bf16.msra.mxu1 %v2667_v45 }
  0x53   : > { %2426 = vmatprep.subr.bf16.mxu1 %v2671_v62 }
  0x54   : > { %1460 = vmatpush1.bf16.msra.mxu0 %v2644_v43  ;;  %v2691_v43 = vld [vmem:[#allocation3 + $0x1a0] ss:$12 sps:$4 sm:$0xff]  }
  0x55   : > { %1461 = vmatprep.subr.bf16.mxu0 %v2650_v44 }
  0x56   : > { %2427 = vmatpush3.bf16.msra.mxu1 %v2675_v0 }
  0x57   : > { %2299 = vmatmul.mubr.msk.bf16.gmra.mrb[16].mxu0 %vm404_vm0, %v2605_v38  ;;  %2476 = vmatprep.subr.bf16.mxu1 %v2679_v4  ;;  %v2707_v4 = vld [vmem:[#allocation3 + $0x1d0] ss:$12 sps:$4 sm:$0xff]  }
  0x58   : > { %511 = vmatprep.mubr.bf16.mxu0 %v2786_v1  ;;  %1462 = vmatpush1.bf16.msra.mxu0 %v2648_v47  ;;  %v2695_v47 = vld [vmem:[#allocation3 + $0x278] ss:$12 sps:$4 sm:$0xff]  }
  0x59   : > { %2307 = vmatmul.mubr.msk.bf16.gmra.mrb[16].mxu1 %vm404_vm0, %v2605_v38  ;;  %1463 = vmatprep.subr.bf16.mxu0 %v2654_v48 }
  0x5a   : > { %624 = vmatprep.mubr.bf16.mxu1 %v2786_v1 }
  0x5c   : > { %1464 = vmatpush1.bf16.msra.mxu0 %v2652_v49 }
  0x5d   : > { %1465 = vmatprep.subr.bf16.mxu0 %v2658_v50 }
  0x5f   : > { %2300 = vmatmul.mubr.msk.bf16.gmra.mrb[20].mxu0 %vm404_vm0, %v2606_v46 }
  0x60   : > { %521 = vmatprep.mubr.bf16.mxu0 %v2786_v1  ;;  %1466 = vmatpush1.bf16.msra.mxu0 %v2656_v52 }
  0x61   : > { %2308 = vmatmul.mubr.msk.bf16.gmra.mrb[20].mxu1 %vm404_vm0, %v2606_v46  ;;  %1467 = vmatprep.subr.bf16.mxu0 %v2662_v53  ;;  %v2690_v46 = vld [vmem:[#allocation3 + $0x1b4] ss:$12 sps:$4 sm:$0xff]  }
  0x62   : > { %634 = vmatprep.mubr.bf16.mxu1 %v2786_v1 }
  0x64   : > { %1468 = vmatpush1.bf16.msra.mxu0 %v2660_v54  ;;  %v2688_v54 = vld [vmem:[#allocation3 + $0x1b0] ss:$12 sps:$4 sm:$0xff]  }
  0x65   : > { %1469 = vmatprep.subr.bf16.mxu0 %v2666_v55  ;;  %v2699_v55 = vld [vmem:[#allocation3 + $0x1b8] ss:$12 sps:$4 sm:$0xff]  }
  0x67   : > { %2301 = vmatmul.mubr.msk.bf16.gmra.mrb[24].mxu0 %vm404_vm0, %v2607_v51 }
  0x68   : > { %531 = vmatprep.mubr.bf16.mxu0 %v2786_v1  ;;  %1470 = vmatpush1.bf16.msra.mxu0 %v2664_v57 }
  0x69   : > { %2309 = vmatmul.mubr.msk.bf16.gmra.mrb[24].mxu1 %vm404_vm0, %v2607_v51  ;;  %1471 = vmatprep.subr.bf16.mxu0 %v2670_v58  ;;  %v2694_v58 = vld [vmem:[#allocation3 + $0x1cc] ss:$12 sps:$4 sm:$0xff]  }
  0x6a   : > { %644 = vmatprep.mubr.bf16.mxu1 %v2786_v1 }
  0x6c   : > { %1472 = vmatpush1.bf16.msra.mxu0 %v2668_v59  ;;  %v2703_v59 = vld [vmem:[#allocation3 + $0x290] ss:$12 sps:$4 sm:$0xff]  }
  0x6d   : > { %1473 = vmatprep.subr.bf16.mxu0 %v2674_v60 }
  0x6f   : > { %2302 = vmatmul.mubr.msk.bf16.gmra.mrb[28].mxu0 %vm404_vm0, %v2611_v56 }
  0x70   : > { %1474 = vmatpush1.bf16.msra.mxu0 %v2672_v61 }
  0x71   : > { %2310 = vmatmul.mubr.msk.bf16.gmra.mrb[28].mxu1 %vm404_vm0, %v2611_v56  ;;  %1475 = vmatprep.subr.bf16.mxu0 %v2678_v63 }
  0x74   : > { %1476 = vmatpush1.bf16.msra.mxu0 %v2676_v2 }
  0x75   : > { %1558 = vmatprep.subr.bf16.mxu0 %v2682_v3  ;;  %v2692_v3 = vld [vmem:[#allocation3 + $0x1c8] ss:$12 sps:$4 sm:$0xff]  }
 0x10a   : > { %v463_v18 = vpop.f32.mrb[0].mxu0 }
 0x10b   : > { %v465_v19 = vpop.f32.mrb[1].mxu0 }
 0x10c   : > { %v467_v21 = vpop.f32.mrb[2].mxu0  ;;  %v2984_v37 = vpop.f32.mrb[0].mxu1 }
 0x10d   : > { %v655_v23 = vpack.c.bf16 %v467_v21, %v463_v18  ;;  %v469_v24 = vpop.f32.mrb[3].mxu0  ;;  %v2986_v40 = vpop.f32.mrb[1].mxu1  ;;  %v2696_v21 = vld [vmem:[#allocation3 + $0x1e0] ss:$12 sps:$4 sm:$0xff]  }
 0x10e   : > { %v656_v25 = vpack.c.bf16 %v469_v24, %v465_v19  ;;  %v2988_v44 = vpop.f32.mrb[2].mxu1 }
 0x10f   : > { %v741_v26 = vadd.bf16 %v2975_v20, %v655_v23  ;;  %v657_v48 = vpack.c.bf16 %v2988_v44, %v2984_v37  ;;  %v2993_v49 = vpop.f32.mrb[3].mxu1  ;;  %v2715_v23 = vld [vmem:[#allocation3 + $0x1e8] ss:$12 sps:$4 sm:$0xff]  }
 0x110   : > { %v742_v27 = vadd.bf16 %v2978_v22, %v656_v25  ;;  %v658_v51 = vpack.c.bf16 %v2993_v49, %v2986_v40  ;;  %v2736_v49 = vld [vmem:[#allocation3 + $0x2d0] ss:$12 sps:$4 sm:$0xff]  }
 0x111   : > { %v773_v32 = vmax.bf16 %v2786_v1, %v741_v26  ;;  %v2702_v26 = vld [vmem:[#allocation3 + $0x1fc] ss:$12 sps:$4 sm:$0xff]  }
 0x112   : > { %v473_v28 = vpop.f32.mrb[4].mxu0  ;;  %v774_v29 = vmax.bf16 %v2786_v1, %v742_v27  ;;  %v2719_v27 = vld [vmem:[#allocation3 + $0x2c0] ss:$12 sps:$4 sm:$0xff]  }
 0x113   : > { %v475_v33 = vpop.f32.mrb[5].mxu0 }
 0x114   : > { %v477_v36 = vpop.f32.mrb[6].mxu0  ;;  %1477 = vmatprep.mubr.bf16.mxu0 %v774_v29  ;;  %1703 = vmatprep.mubr.bf16.mxu1 %v774_v29  ;;  %v3000_v61 = vpop.f32.mrb[4].mxu1 }
 0x115   : > { %v659_v38 = vpack.c.bf16 %v477_v36, %v473_v28  ;;  %v479_v39 = vpop.f32.mrb[7].mxu0  ;;  %1478 = vmatmul.mubr.bf16.vlgmr.msra.gmra.mrb[32].mxu0 %v773_v32  ;;  %1704 = vmatmul.mubr.bf16.vlgmr.msra.gmra.mrb[32].mxu1 %v773_v32  ;;  %v3002_v0 = vpop.f32.mrb[5].mxu1 }
 0x116   : > { %v660_v41 = vpack.c.bf16 %v479_v39, %v475_v33  ;;  %2477 = vmatpush3.bf16.msra.mxu1 %v2683_v31  ;;  %1559 = vmatpush1.bf16.msra.mxu0 %v2680_v30  ;;  %v3004_v5 = vpop.f32.mrb[6].mxu1  ;;  %v2706_v39 = vld [vmem:[#allocation3 + $0x214] ss:$12 sps:$4 sm:$0xff]  }
 0x117   : > { %v745_v45 = vadd.bf16 %v2975_v20, %v659_v38  ;;  %1560 = vmatprep.subr.bf16.mxu0 %v2686_v34  ;;  %2478 = vmatprep.subr.bf16.mxu1 %v2687_v35  ;;  %v661_v10 = vpack.c.bf16 %v3004_v5, %v3000_v61  ;;  %v3009_v12 = vpop.f32.mrb[7].mxu1  ;;  %v2700_v34 = vld [vmem:[#allocation3 + $0x1f8] ss:$12 sps:$4 sm:$0xff]   ;;  %v2723_v35 = vld [vmem:[#allocation3 + $0x200] ss:$12 sps:$4 sm:$0xff]  }
 0x118   : > { %v746_v50 = vadd.bf16 %v2978_v22, %v660_v41  ;;  %v662_v17 = vpack.c.bf16 %v3009_v12, %v3002_v0  ;;  %v2727_v41 = vld [vmem:[#allocation3 + $0x2d8] ss:$12 sps:$4 sm:$0xff]  }
 0x119   : > { %v777_v57 = vmax.bf16 %v2786_v1, %v745_v45 }
 0x11a   : > { %v483_v52 = vpop.f32.mrb[8].mxu0  ;;  %1561 = vmatpush1.bf16.msra.mxu0 %v2684_v42  ;;  %v778_v53 = vmax.bf16 %v2786_v1, %v746_v50  ;;  %2479 = vmatpush3.bf16.msra.mxu1 %v2691_v43 }
 0x11b   : > { %v485_v56 = vpop.f32.mrb[9].mxu0  ;;  %1562 = vmatprep.subr.bf16.mxu0 %v2690_v46  ;;  %2480 = vmatprep.subr.bf16.mxu1 %v2695_v47 }
 0x11c   : > { %v487_v60 = vpop.f32.mrb[10].mxu0  ;;  %1487 = vmatprep.mubr.bf16.mxu0 %v778_v53  ;;  %1711 = vmatprep.mubr.bf16.mxu1 %v778_v53  ;;  %v3016_v29 = vpop.f32.mrb[8].mxu1  ;;  %v2731_v53 = vld [vmem:[#allocation3 + $0x218] ss:$12 sps:$4 sm:$0xff]  }
 0x11d   : > { %v663_v62 = vpack.c.bf16 %v487_v60, %v483_v52  ;;  %v489_v63 = vpop.f32.mrb[11].mxu0  ;;  %1488 = vmatmul.mubr.bf16.gmra.mrb[36].mxu0 %v777_v57  ;;  %1712 = vmatmul.mubr.bf16.gmra.mrb[36].mxu1 %v777_v57  ;;  %v3018_v32 = vpop.f32.mrb[9].mxu1  ;;  %v2704_v52 = vld [vmem:[#allocation3 + $0x210] ss:$12 sps:$4 sm:$0xff]  }
 0x11e   : > { %v664_v2 = vpack.c.bf16 %v489_v63, %v485_v56  ;;  %1563 = vmatpush1.bf16.msra.mxu0 %v2688_v54  ;;  %2481 = vmatpush3.bf16.msra.mxu1 %v2699_v55  ;;  %v3020_v36 = vpop.f32.mrb[10].mxu1  ;;  %v2710_v56 = vld [vmem:[#allocation3 + $0x22c] ss:$12 sps:$4 sm:$0xff]   ;;  %v2735_v57 = vld [vmem:[#allocation3 + $0x2f0] ss:$12 sps:$4 sm:$0xff]  }
 0x11f   : > { %v749_v6 = vadd.bf16 %v2975_v20, %v663_v62  ;;  %1564 = vmatprep.subr.bf16.mxu0 %v2694_v58  ;;  %2482 = vmatprep.subr.bf16.mxu1 %v2703_v59  ;;  %v665_v42 = vpack.c.bf16 %v3020_v36, %v3016_v29  ;;  %v3025_v43 = vpop.f32.mrb[11].mxu1 }
 0x120   : > { %v750_v15 = vadd.bf16 %v2978_v22, %v664_v2  ;;  %v666_v46 = vpack.c.bf16 %v3025_v43, %v3018_v32 }
 0x121   : > { %v781_v25 = vmax.bf16 %v2786_v1, %v749_v6 }
 0x122   : > { %v493_v18 = vpop.f32.mrb[12].mxu0  ;;  %1565 = vmatpush1.bf16.msra.mxu0 %v2692_v3  ;;  %v782_v19 = vmax.bf16 %v2786_v1, %v750_v15  ;;  %2483 = vmatpush3.bf16.msra.mxu1 %v2707_v4  ;;  %v2708_v3 = vld [vmem:[#allocation3 + $0x228] ss:$12 sps:$4 sm:$0xff]   ;;  %v2739_v4 = vld [vmem:[#allocation3 + $0x230] ss:$12 sps:$4 sm:$0xff]  }
 0x123   : > { %v495_v24 = vpop.f32.mrb[13].mxu0  ;;  %1566 = vmatprep.subr.bf16.mxu0 %v2698_v7  ;;  %2484 = vmatprep.subr.bf16.mxu1 %v2711_v8  ;;  %v2714_v8 = vld [vmem:[#allocation3 + $0x244] ss:$12 sps:$4 sm:$0xff]  }
 0x124   : > { %v497_v28 = vpop.f32.mrb[14].mxu0  ;;  %1497 = vmatprep.mubr.bf16.mxu0 %v782_v19  ;;  %1719 = vmatprep.mubr.bf16.mxu1 %v782_v19  ;;  %v3032_v59 = vpop.f32.mrb[12].mxu1 }
 0x125   : > { %v667_v30 = vpack.c.bf16 %v497_v28, %v493_v18  ;;  %v499_v31 = vpop.f32.mrb[15].mxu0  ;;  %1498 = vmatmul.mubr.bf16.gmra.mrb[40].mxu0 %v781_v25  ;;  %1720 = vmatmul.mubr.bf16.gmra.mrb[40].mxu1 %v781_v25  ;;  %v3034_v63 = vpop.f32.mrb[13].mxu1  ;;  %v2712_v25 = vld [vmem:[#allocation3 + $0x240] ss:$12 sps:$4 sm:$0xff]   ;;  %v2718_v28 = vld [vmem:[#allocation3 + $0x25c] ss:$12 sps:$4 sm:$0xff]  }
 0x126   : > { %v668_v33 = vpack.c.bf16 %v499_v31, %v495_v24  ;;  %1567 = vmatpush1.bf16.msra.mxu0 %v2696_v21  ;;  %2485 = vmatpush3.bf16.msra.mxu1 %v2715_v23  ;;  %v3036_v6 = vpop.f32.mrb[14].mxu1 }
 0x127   : > { %v753_v38 = vadd.bf16 %v2975_v20, %v667_v30  ;;  %1568 = vmatprep.subr.bf16.mxu0 %v2702_v26  ;;  %2486 = vmatprep.subr.bf16.mxu1 %v2719_v27  ;;  %v669_v15 = vpack.c.bf16 %v3036_v6, %v3032_v59  ;;  %v3041_v18 = vpop.f32.mrb[15].mxu1 }
 0x128   : > { %v754_v45 = vadd.bf16 %v2978_v22, %v668_v33  ;;  %v670_v21 = vpack.c.bf16 %v3041_v18, %v3034_v63 }
 0x129   : > { %v785_v55 = vmax.bf16 %v2786_v1, %v753_v38 }
 0x12a   : > { %v503_v47 = vpop.f32.mrb[16].mxu0  ;;  %1569 = vmatpush1.bf16.msra.mxu0 %v2700_v34  ;;  %v786_v50 = vmax.bf16 %v2786_v1, %v754_v45  ;;  %2487 = vmatpush3.bf16.msra.mxu1 %v2723_v35 }
 0x12b   : > { %v505_v54 = vpop.f32.mrb[17].mxu0  ;;  %1570 = vmatprep.subr.bf16.mxu0 %v2706_v39  ;;  %2488 = vmatprep.subr.bf16.mxu1 %v2727_v41  ;;  %v2716_v39 = vld [vmem:[#allocation3 + $0x258] ss:$12 sps:$4 sm:$0xff]  }
 0x12c   : > { %v507_v58 = vpop.f32.mrb[18].mxu0  ;;  %1507 = vmatprep.mubr.bf16.mxu0 %v786_v50  ;;  %1727 = vmatprep.mubr.bf16.mxu1 %v786_v50  ;;  %v3048_v31 = vpop.f32.mrb[16].mxu1 }
 0x12d   : > { %v671_v60 = vpack.c.bf16 %v507_v58, %v503_v47  ;;  %v509_v62 = vpop.f32.mrb[19].mxu0  ;;  %1508 = vmatmul.mubr.bf16.gmra.mrb[44].mxu0 %v785_v55  ;;  %1728 = vmatmul.mubr.bf16.gmra.mrb[44].mxu1 %v785_v55  ;;  %v3050_v35 = vpop.f32.mrb[17].mxu1  ;;  %v2722_v47 = vld [vmem:[#allocation3 + $0x274] ss:$12 sps:$4 sm:$0xff]   ;;  %v712_v58 = vcombine.high %v2965_v14, %v2965_v14 }
 0x12e   : > { %v672_v2 = vpack.c.bf16 %v509_v62, %v505_v54  ;;  %1571 = vmatpush1.bf16.msra.mxu0 %v2704_v52  ;;  %2489 = vmatpush3.bf16.msra.mxu1 %v2731_v53  ;;  %v3052_v41 = vpop.f32.mrb[18].mxu1 }
 0x12f   : > { %v757_v7 = vadd.bf16 %v2975_v20, %v671_v60  ;;  %1572 = vmatprep.subr.bf16.mxu0 %v2710_v56  ;;  %2490 = vmatprep.subr.bf16.mxu1 %v2735_v57  ;;  %v673_v50 = vpack.c.bf16 %v3052_v41, %v3048_v31  ;;  %v3057_v52 = vpop.f32.mrb[19].mxu1  ;;  %v2720_v57 = vld [vmem:[#allocation3 + $0x270] ss:$12 sps:$4 sm:$0xff]   ;;  %v735_v14 = vpack.i.b16 %v712_v58, %v712_v58 }
 0x130   : > { %v758_v19 = vadd.bf16 %v2978_v22, %v672_v2  ;;  %v674_v54 = vpack.c.bf16 %v3057_v52, %v3050_v35  ;;  %v2726_v2 = vld [vmem:[#allocation3 + $0x28c] ss:$12 sps:$4 sm:$0xff]  }
 0x131   : > { %v789_v27 = vmax.bf16 %v2786_v1, %v757_v7 }
 0x132   : > { %v513_v23 = vpop.f32.mrb[20].mxu0  ;;  %1573 = vmatpush1.bf16.msra.mxu0 %v2708_v3  ;;  %v790_v24 = vmax.bf16 %v2786_v1, %v758_v19  ;;  %2491 = vmatpush3.bf16.msra.mxu1 %v2739_v4 }
 0x133   : > { %v515_v26 = vpop.f32.mrb[21].mxu0  ;;  %1574 = vmatprep.subr.bf16.mxu0 %v2714_v8 }
 0x134   : > { %v517_v30 = vpop.f32.mrb[22].mxu0  ;;  %1517 = vmatprep.mubr.bf16.mxu0 %v790_v24  ;;  %1735 = vmatprep.mubr.bf16.mxu1 %v790_v24  ;;  %v3066_v4 = vpop.f32.mrb[20].mxu1  ;;  %v2724_v24 = vld [vmem:[#allocation3 + $0x288] ss:$12 sps:$4 sm:$0xff]  }
 0x135   : > { %v675_v33 = vpack.c.bf16 %v517_v30, %v513_v23  ;;  %v519_v34 = vpop.f32.mrb[23].mxu0  ;;  %1518 = vmatmul.mubr.bf16.gmra.mrb[48].mxu0 %v789_v27  ;;  %1736 = vmatmul.mubr.bf16.gmra.mrb[48].mxu1 %v789_v27  ;;  %v3068_v19 = vpop.f32.mrb[21].mxu1  ;;  %v2730_v27 = vld [vmem:[#allocation3 + $0x2a4] ss:$12 sps:$4 sm:$0xff]  }
 0x136   : > { %v676_v38 = vpack.c.bf16 %v519_v34, %v515_v26  ;;  %1575 = vmatpush1.bf16.msra.mxu0 %v2712_v25  ;;  %v3070_v25 = vpop.f32.mrb[22].mxu1 }
 0x137   : > { %v761_v45 = vadd.bf16 %v2975_v20, %v675_v33  ;;  %1576 = vmatprep.subr.bf16.mxu0 %v2718_v28  ;;  %v677_v28 = vpack.c.bf16 %v3070_v25, %v3066_v4  ;;  %v3075_v30 = vpop.f32.mrb[23].mxu1 }
 0x138   : > { %v762_v53 = vadd.bf16 %v2978_v22, %v676_v38  ;;  %v678_v34 = vpack.c.bf16 %v3075_v30, %v3068_v19 }
 0x139   : > { %v793_v62 = vmax.bf16 %v2786_v1, %v761_v45  ;;  %v2728_v45 = vld [vmem:[#allocation3 + $0x2a0] ss:$12 sps:$4 sm:$0xff]  }
 0x13a   : > { %v523_v55 = vpop.f32.mrb[24].mxu0  ;;  %1577 = vmatpush1.bf16.msra.mxu0 %v2716_v39  ;;  %v794_v56 = vmax.bf16 %v2786_v1, %v762_v53 }
 0x13b   : > { %v525_v60 = vpop.f32.mrb[25].mxu0  ;;  %1578 = vmatprep.subr.bf16.mxu0 %v2722_v47  ;;  %v3082_v47 = vrot.slane %v735_v14, %v2970_v16 }
 0x13c   : > { %v527_v3 = vpop.f32.mrb[26].mxu0  ;;  %1527 = vmatprep.mubr.bf16.mxu0 %v794_v56  ;;  %1743 = vmatprep.mubr.bf16.mxu1 %v794_v56  ;;  %v711_v56 = vcombine.high %v2962_v13, %v2962_v13 }
 0x13d   : > { %v679_v7 = vpack.c.bf16 %v527_v3, %v523_v55  ;;  %v529_v8 = vpop.f32.mrb[27].mxu0  ;;  %1528 = vmatmul.mubr.bf16.gmra.mrb[52].mxu0 %v793_v62  ;;  %1744 = vmatmul.mubr.bf16.gmra.mrb[52].mxu1 %v793_v62  ;;  %v744_v13 = vadd.bf16 %v3082_v47, %v658_v51  ;;  %v752_v37 = vadd.bf16 %v3082_v47, %v666_v46 }
 0x13e   : > { %v680_v23 = vpack.c.bf16 %v529_v8, %v525_v60  ;;  %1579 = vmatpush1.bf16.msra.mxu0 %v2720_v57  ;;  %v2734_v57 = vld [vmem:[#allocation3 + $0x2bc] ss:$12 sps:$4 sm:$0xff]   ;;  %v3087_v60 = vpop.f32.mrb[24].mxu1  ;;  %v2732_v8 = vld [vmem:[#allocation3 + $0x2b8] ss:$12 sps:$4 sm:$0xff]   ;;  %v728_v14 = vpack.i.b16 %v711_v56, %v711_v56  ;;  %v760_v32 = vadd.bf16 %v3082_v47, %v674_v54  ;;  %v764_v43 = vadd.bf16 %v3082_v47, %v678_v34 }
 0x13f   : > { %v765_v26 = vadd.bf16 %v2975_v20, %v679_v7  ;;  %1580 = vmatprep.subr.bf16.mxu0 %v2726_v2  ;;  %v3089_v3 = vpop.f32.mrb[25].mxu1  ;;  %v776_v51 = vmax.bf16 %v2786_v1, %v744_v13  ;;  %v2740_v56 = vld [vmem:[#allocation3 + $0x2e8] ss:$12 sps:$4 sm:$0xff]  }
 0x140   : > { %v766_v33 = vadd.bf16 %v2978_v22, %v680_v23  ;;  %v3095_v23 = vpop.f32.mrb[26].mxu1  ;;  %v792_v36 = vmax.bf16 %v2786_v1, %v760_v32  ;;  %v796_v59 = vmax.bf16 %v2786_v1, %v764_v43 }
 0x141   : > { %v797_v55 = vmax.bf16 %v2786_v1, %v765_v26  ;;  %v2738_v26 = vld [vmem:[#allocation3 + $0x2d4] ss:$12 sps:$4 sm:$0xff]  }
 0x142   : > { %v533_v38 = vpop.f32.mrb[28].mxu0  ;;  %1581 = vmatpush1.bf16.msra.mxu0 %v2724_v24  ;;  %v798_v39 = vmax.bf16 %v2786_v1, %v766_v33  ;;  %v3100_v33 = vpop.f32.mrb[27].mxu1 }
 0x143   : > { %v535_v53 = vpop.f32.mrb[29].mxu0  ;;  %1582 = vmatprep.subr.bf16.mxu0 %v2730_v27  ;;  %v681_v27 = vpack.c.bf16 %v3095_v23, %v3087_v60 }
 0x144   : > { %v537_v58 = vpop.f32.mrb[30].mxu0  ;;  %1537 = vmatprep.mubr.bf16.mxu0 %v798_v39  ;;  %1751 = vmatprep.mubr.bf16.mxu1 %v798_v39  ;;  %v682_v39 = vpack.c.bf16 %v3100_v33, %v3089_v3 }
 0x145   : > { %v683_v62 = vpack.c.bf16 %v537_v58, %v533_v38  ;;  %v539_v2 = vpop.f32.mrb[31].mxu0  ;;  %1538 = vmatmul.mubr.bf16.gmra.mrb[56].mxu0 %v797_v55  ;;  %1752 = vmatmul.mubr.bf16.gmra.mrb[56].mxu1 %v797_v55  ;;  %v3111_v55 = vpop.f32.mrb[28].mxu1 }
 0x146   : > { %v684_v7 = vpack.c.bf16 %v539_v2, %v535_v53  ;;  %1583 = vmatpush1.bf16.msra.mxu0 %v2728_v45  ;;  %v2742_v53 = vld [vmem:[#allocation3 + $0x2ec] ss:$12 sps:$4 sm:$0xff]   ;;  %v768_v6 = vadd.bf16 %v3082_v47, %v682_v39 }
 0x147   : > { %v769_v24 = vadd.bf16 %v2975_v20, %v683_v62  ;;  %1584 = vmatprep.subr.bf16.mxu0 %v2734_v57  ;;  %v3108_v20 = vrot.slane %v728_v14, %v2970_v16  ;;  %v748_v57 = vadd.bf16 %v3082_v47, %v662_v17  ;;  %v756_v17 = vadd.bf16 %v3082_v47, %v670_v21 }
 0x148   : > { %v770_v38 = vadd.bf16 %v2978_v22, %v684_v7  ;;  %v648_v22 = vpop.f32.mrb[29].mxu1  ;;  %v800_v18 = vmax.bf16 %v2786_v1, %v768_v6 }
 0x149   : > { %v801_v45 = vmax.bf16 %v2786_v1, %v769_v24  ;;  %v3117_v58 = vpop.f32.mrb[30].mxu1  ;;  %v743_v62 = vadd.bf16 %v3108_v20, %v657_v48  ;;  %v780_v13 = vmax.bf16 %v2786_v1, %v748_v57  ;;  %v747_v44 = vadd.bf16 %v3108_v20, %v661_v10 }
 0x14a   : > { %1585 = vmatpush1.bf16.msra.mxu0 %v2732_v8  ;;  %v802_v40 = vmax.bf16 %v2786_v1, %v770_v38  ;;  %v685_v2 = vpack.c.bf16 %v3117_v58, %v3111_v55  ;;  %v652_v7 = vpop.f32.mrb[31].mxu1  ;;  %v784_v48 = vmax.bf16 %v2786_v1, %v752_v37  ;;  %v751_v61 = vadd.bf16 %v3108_v20, %v665_v42 }
 0x14b   : > { %1586 = vmatprep.subr.bf16.mxu0 %v2738_v26  ;;  %v686_v8 = vpack.c.bf16 %v652_v7, %v648_v22  ;;  %v775_v0 = vmax.bf16 %v2786_v1, %v743_v62  ;;  %v779_v12 = vmax.bf16 %v2786_v1, %v747_v44  ;;  %v788_v5 = vmax.bf16 %v2786_v1, %v756_v17 }
 0x14c   : > { %1547 = vmatprep.mubr.bf16.mxu0 %v802_v40  ;;  %1759 = vmatprep.mubr.bf16.mxu1 %v802_v40  ;;  %v783_v10 = vmax.bf16 %v2786_v1, %v751_v61  ;;  %v755_v29 = vadd.bf16 %v3108_v20, %v669_v15  ;;  %v759_v46 = vadd.bf16 %v3108_v20, %v673_v50 }
 0x14d   : > { %1548 = vmatmul.mubr.bf16.gmra.mrb[60].mxu0 %v801_v45  ;;  %1760 = vmatmul.mubr.bf16.gmra.mrb[60].mxu1 %v801_v45  ;;  %v763_v15 = vadd.bf16 %v3108_v20, %v677_v28  ;;  %v772_v31 = vadd.bf16 %v3082_v47, %v686_v8  ;;  %v767_v35 = vadd.bf16 %v3108_v20, %v681_v27 }
 0x14e   : > { %1587 = vmatpush1.bf16.msra.mxu0 %v2736_v49  ;;  %1590 = vmatprep.mubr.bf16.mxu0 %v776_v51  ;;  %v787_v42 = vmax.bf16 %v2786_v1, %v755_v29  ;;  %v791_v63 = vmax.bf16 %v2786_v1, %v759_v46  ;;  %v771_v52 = vadd.bf16 %v3108_v20, %v685_v2 }
 0x14f   : > { %1588 = vmatprep.subr.bf16.mxu0 %v2742_v53  ;;  %1800 = vmatprep.mubr.bf16.mxu1 %v776_v51  ;;  %v795_v21 = vmax.bf16 %v2786_v1, %v763_v15  ;;  %v804_v41 = vmax.bf16 %v2786_v1, %v772_v31  ;;  %v799_v50 = vmax.bf16 %v2786_v1, %v767_v35 }
 0x150   : > { %v803_v54 = vmax.bf16 %v2786_v1, %v771_v52 }
 0x152   : > { %1589 = vmatpush1.bf16.msra.mxu0 %v2740_v56 }
 0x155   : > { %1591 = vmatmul.mubr.bf16.vlgmr.msra.gmra.mrb[32].mxu0 %v775_v0  ;;  %1801 = vmatmul.mubr.bf16.vlgmr.msra.gmra.mrb[64].mxu1 %v775_v0 }
 0x156   : > { %1600 = vmatprep.mubr.bf16.mxu0 %v780_v13  ;;  %1808 = vmatprep.mubr.bf16.mxu1 %v780_v13 }
 0x15d   : > { %1601 = vmatmul.mubr.bf16.gmra.mrb[36].mxu0 %v779_v12  ;;  %1809 = vmatmul.mubr.bf16.gmra.mrb[68].mxu1 %v779_v12 }
 0x15e   : > { %1610 = vmatprep.mubr.bf16.mxu0 %v784_v48  ;;  %1816 = vmatprep.mubr.bf16.mxu1 %v784_v48 }
 0x165   : > { %1611 = vmatmul.mubr.bf16.gmra.mrb[40].mxu0 %v783_v10  ;;  %1817 = vmatmul.mubr.bf16.gmra.mrb[72].mxu1 %v783_v10  ;;  %v2408_v10 = vld.sshfl [vmem:[%s3401_s4] sm:$0x13 pattern:$0x75316420] }
 0x166   : > { %1620 = vmatprep.mubr.bf16.mxu0 %v788_v5  ;;  %1824 = vmatprep.mubr.bf16.mxu1 %v788_v5  ;;  %v1898_v29 = vcombine.high %v2408_v10, %v2408_v10  ;;  %v1905_v43 = vrot.slane %v2408_v10, %v2959_v11 }
 0x16d   : > { %1621 = vmatmul.mubr.bf16.gmra.mrb[44].mxu0 %v787_v42  ;;  %1825 = vmatmul.mubr.bf16.gmra.mrb[76].mxu1 %v787_v42 }
 0x16e   : > { %1630 = vmatprep.mubr.bf16.mxu0 %v792_v36  ;;  %1832 = vmatprep.mubr.bf16.mxu1 %v792_v36 }
 0x175   : > { %1631 = vmatmul.mubr.bf16.gmra.mrb[48].mxu0 %v791_v63  ;;  %1833 = vmatmul.mubr.bf16.gmra.mrb[80].mxu1 %v791_v63  ;;  %v1912_v63 = vrot.slane %v1898_v29, %v2959_v11 }
 0x176   : > { %1640 = vmatprep.mubr.bf16.mxu0 %v796_v59  ;;  %1840 = vmatprep.mubr.bf16.mxu1 %v796_v59 }
 0x177   : > { %v1922_v31 = vpack.i.b16 %v1912_v63, %v1912_v63 }
 0x17d   : > { %1641 = vmatmul.mubr.bf16.gmra.mrb[52].mxu0 %v795_v21  ;;  %1841 = vmatmul.mubr.bf16.gmra.mrb[84].mxu1 %v795_v21  ;;  %v1913_v21 = vcombine.high %v1905_v43, %v1905_v43 }
 0x17e   : > { %1650 = vmatprep.mubr.bf16.mxu0 %v800_v18  ;;  %1848 = vmatprep.mubr.bf16.mxu1 %v800_v18  ;;  %v1915_v18 = vpack.i.b16 %v1905_v43, %v1905_v43 }
 0x17f   : > { %v1929_v11 = vpack.i.b16 %v1913_v21, %v1913_v21 }
 0x185   : > { %1651 = vmatmul.mubr.bf16.gmra.mrb[56].mxu0 %v799_v50  ;;  %1849 = vmatmul.mubr.bf16.gmra.mrb[88].mxu1 %v799_v50 }
 0x186   : > { %1660 = vmatprep.mubr.bf16.mxu0 %v804_v41  ;;  %1856 = vmatprep.mubr.bf16.mxu1 %v804_v41 }
 0x18d   : > { %1661 = vmatmul.mubr.bf16.gmra.mrb[60].mxu0 %v803_v54  ;;  %1857 = vmatmul.mubr.bf16.gmra.mrb[92].mxu1 %v803_v54  ;;  %v3224_v54 = vrot.slane %v1915_v18, %v2970_v16 }
 0x1e8   : > { %v2428_v4 = vpop.f32.mrb[32].mxu1 }
 0x1e9   : > { %v2429_v19 = vpop.f32.mrb[33].mxu1 }
 0x1ea   : > { %v3186_v25 = vadd.f32 %v2429_v19, %v2428_v4  ;;  %v2431_v28 = vpop.f32.mrb[34].mxu1 }
 0x1eb   : > { %v2432_v30 = vpop.f32.mrb[35].mxu1 }
 0x1ec   : > { %v3188_v34 = vadd.f32 %v2432_v30, %v2431_v28  ;;  %v3227_v30 = vrot.slane %v1922_v31, %v2970_v16 }
 0x1f0   : > { %v2434_v47 = vpop.f32.mrb[36].mxu1 }
 0x1f1   : > { %v2435_v60 = vpop.f32.mrb[37].mxu1 }
 0x1f2   : > { %v3190_v3 = vadd.f32 %v2435_v60, %v2434_v47  ;;  %v2437_v23 = vpop.f32.mrb[38].mxu1 }
 0x1f3   : > { %v2438_v24 = vpop.f32.mrb[39].mxu1 }
 0x1f4   : > { %v3192_v14 = vadd.f32 %v2438_v24, %v2437_v23  ;;  %v1983_v24 = vld [vmem:[%s3402_s5] sm:$0x7] }
 0x1f8   : > { %v2440_v26 = vpop.f32.mrb[40].mxu1 }
 0x1f9   : > { %v2441_v27 = vpop.f32.mrb[41].mxu1 }
 0x1fa   : > { %v3194_v33 = vadd.f32 %v2441_v27, %v2440_v26  ;;  %v2443_v38 = vpop.f32.mrb[42].mxu1 }
 0x1fb   : > { %v2444_v39 = vpop.f32.mrb[43].mxu1 }
 0x1fc   : > { %v3196_v40 = vadd.f32 %v2444_v39, %v2443_v38  ;;  %v2039_v39 = vsub.s32 1, %v2953_v9 }
 0x200   : > { %v2446_v49 = vpop.f32.mrb[44].mxu1 }
 0x201   : > { %v2447_v51 = vpop.f32.mrb[45].mxu1 }
 0x202   : > { %v3198_v20 = vadd.f32 %v2447_v51, %v2446_v49  ;;  %v2449_v45 = vpop.f32.mrb[46].mxu1 }
 0x203   : > { %v2450_v53 = vpop.f32.mrb[47].mxu1 }
 0x204   : > { %v3200_v55 = vadd.f32 %v2450_v53, %v2449_v45  ;;  %v3238_v53 = vrot.slane %v1929_v11, %v2970_v16 }
 0x208   : > { %v2452_v22 = vpop.f32.mrb[48].mxu1 }
 0x209   : > { %v2453_v56 = vpop.f32.mrb[49].mxu1 }
 0x20a   : > { %v3202_v57 = vadd.f32 %v2453_v56, %v2452_v22  ;;  %v2455_v58 = vpop.f32.mrb[50].mxu1  ;;  %v3241_v22 = vrot.slane %v1983_v24, %v2970_v16  ;;  %v2043_v56 = vsub.s32 2, %v2953_v9 }
 0x20b   : > { %v2456_v62 = vpop.f32.mrb[51].mxu1 }
 0x20c   : > { %v3204_v2 = vadd.f32 %v2456_v62, %v2455_v58 }
 0x210   : > { %v2458_v7 = vpop.f32.mrb[52].mxu1 }
 0x211   : > { %v2459_v8 = vpop.f32.mrb[53].mxu1 }
 0x212   : > { %v3206_v13 = vadd.f32 %v2459_v8, %v2458_v7  ;;  %v2461_v0 = vpop.f32.mrb[54].mxu1 }
 0x213   : > { %v2462_v37 = vpop.f32.mrb[55].mxu1 }
 0x214   : > { %v3208_v44 = vadd.f32 %v2462_v37, %v2461_v0  ;;  %v3246_v0 = vrot.slane %v1983_v24, %v2039_v39 }
 0x218   : > { %v2464_v48 = vpop.f32.mrb[56].mxu1 }
 0x219   : > { %v2465_v12 = vpop.f32.mrb[57].mxu1 }
 0x21a   : > { %v3210_v17 = vadd.f32 %v2465_v12, %v2464_v48  ;;  %v2467_v61 = vpop.f32.mrb[58].mxu1 }
 0x21b   : > { %v2468_v5 = vpop.f32.mrb[59].mxu1 }
 0x21c   : > { %v3215_v32 = vadd.f32 %v2468_v5, %v2467_v61 }
 0x220   : > { %v2470_v36 = vpop.f32.mrb[60].mxu1 }
 0x221   : > { %v2471_v42 = vpop.f32.mrb[61].mxu1 }
 0x222   : > { %v3218_v46 = vadd.f32 %v2471_v42, %v2470_v36  ;;  %v2473_v59 = vpop.f32.mrb[62].mxu1  ;;  %v3249_v36 = vrot.slane %v1983_v24, %v2043_v56 }
 0x223   : > { %v2474_v6 = vpop.f32.mrb[63].mxu1 }
 0x224   : > { %v3221_v15 = vadd.f32 %v2474_v6, %v2473_v59 }
 0x228   : > { %v1592_v35 = vpop.f32.mrb[32].mxu0  ;;  %v2492_v41 = vpop.f32.mrb[64].mxu1 }
 0x229   : > { %v1594_v50 = vpop.f32.mrb[33].mxu0  ;;  %v2493_v52 = vpop.f32.mrb[65].mxu1 }
 0x22a   : > { %v2494_v4 = vadd.f32 %v2493_v52, %v2492_v41  ;;  %v1596_v19 = vpop.f32.mrb[34].mxu0  ;;  %v2495_v28 = vpop.f32.mrb[66].mxu1 }
 0x22b   : > { %v1865_v47 = vpack.c.bf16 %v1596_v19, %v1592_v35  ;;  %v1598_v60 = vpop.f32.mrb[35].mxu0  ;;  %v2496_v23 = vpop.f32.mrb[67].mxu1 }
 0x22c   : > { %v1803_v26 = vadd.f32 %v2494_v4, %v3186_v25  ;;  %v1866_v27 = vpack.c.bf16 %v1598_v60, %v1594_v50  ;;  %v2497_v38 = vadd.f32 %v2496_v23, %v2495_v28 }
 0x22d   : > { %v1935_v49 = vadd.bf16 %v3224_v54, %v1865_v47 }
 0x22e   : > { %v1936_v51 = vadd.bf16 %v3227_v30, %v1866_v27  ;;  %v1806_v45 = vadd.f32 %v2497_v38, %v3188_v34 }
 0x22f   : > { %v1959_v25 = vmax.bf16 %v2786_v1, %v1935_v49 }
 0x230   : > { %v1960_v58 = vmax.bf16 %v2786_v1, %v1936_v51  ;;  %v1867_v62 = vpack.c.bf16 %v1806_v45, %v1803_v26  ;;  %v1602_v7 = vpop.f32.mrb[36].mxu0  ;;  %v2498_v8 = vpop.f32.mrb[68].mxu1 }
 0x231   : > { %v1987_v37 = vunpack.c.h.bf16 %v1959_v25  ;;  %v1604_v48 = vpop.f32.mrb[37].mxu0  ;;  %v2499_v34 = vpop.f32.mrb[69].mxu1  ;;  %v1984_v12 = vunpack.c.l.bf16 %v1959_v25 }
 0x232   : > { %v1988_v61 = vunpack.c.h.bf16 %v1960_v58  ;;  %v1937_v5 = vadd.bf16 %v3238_v53, %v1867_v62  ;;  %v2500_v16 = vadd.f32 %v2499_v34, %v2498_v8  ;;  %v1606_v10 = vpop.f32.mrb[38].mxu0  ;;  %v2501_v29 = vpop.f32.mrb[70].mxu1  ;;  %v1985_v9 = vunpack.c.l.bf16 %v1960_v58 }
 0x233   : > { %v1868_v42 = vpack.c.bf16 %v1606_v10, %v1602_v7  ;;  %v1608_v43 = vpop.f32.mrb[39].mxu0  ;;  %v2502_v59 = vpop.f32.mrb[71].mxu1  ;;  %v2048_v63 = vmul.f32 %v3241_v22, %v1984_v12  ;;  %v2051_v6 = vmul.f32 %v3241_v22, %v1987_v37 }
 0x234   : > { %v1811_v18 = vadd.f32 %v2500_v16, %v3190_v3  ;;  %v1869_v21 = vpack.c.bf16 %v1608_v43, %v1604_v48  ;;  %v2503_v31 = vadd.f32 %v2502_v59, %v2501_v29  ;;  %v1961_v35 = vmax.bf16 %v2786_v1, %v1937_v5 }
 0x235   : > { %v1938_v41 = vadd.bf16 %v3224_v54, %v1868_v42  ;;  %v2049_v50 = vmul.f32 %v3246_v0, %v1985_v9  ;;  %v2052_v52 = vmul.f32 %v3246_v0, %v1988_v61 }
 0x236   : > { %v1939_v4 = vadd.bf16 %v3227_v30, %v1869_v21  ;;  %v1814_v19 = vadd.f32 %v2503_v31, %v3192_v14  ;;  %v1986_v28 = vunpack.c.l.bf16 %v1961_v35  ;;  %v1989_v11 = vunpack.c.h.bf16 %v1961_v35 }
 0x237   : > { %v1962_v47 = vmax.bf16 %v2786_v1, %v1938_v41  ;;  %v2096_v60 = vadd.f32 %v2049_v50, %v2048_v63  ;;  %v2100_v3 = vadd.f32 %v2052_v52, %v2051_v6 }
 0x238   : > { %v1963_v23 = vmax.bf16 %v2786_v1, %v1939_v4  ;;  %v1870_v24 = vpack.c.bf16 %v1814_v19, %v1811_v18  ;;  %v1612_v26 = vpop.f32.mrb[40].mxu0  ;;  %v2504_v27 = vpop.f32.mrb[72].mxu1  ;;  %v2050_v38 = vmul.f32 %v3249_v36, %v1986_v28  ;;  %v2053_v39 = vmul.f32 %v3249_v36, %v1989_v11 }
 0x239   : > { %v1993_v49 = vunpack.c.h.bf16 %v1962_v47  ;;  %v1614_v51 = vpop.f32.mrb[41].mxu0  ;;  %v2505_v45 = vpop.f32.mrb[73].mxu1  ;;  %v1990_v56 = vunpack.c.l.bf16 %v1962_v47 }
 0x23a   : > { %v1994_v14 = vunpack.c.h.bf16 %v1963_v23  ;;  %v1940_v25 = vadd.bf16 %v3238_v53, %v1870_v24  ;;  %v2506_v58 = vadd.f32 %v2505_v45, %v2504_v27  ;;  %v1616_v62 = vpop.f32.mrb[42].mxu0  ;;  %v2507_v7 = vpop.f32.mrb[74].mxu1  ;;  %v2097_v8 = vadd.f32 %v2096_v60, %v2050_v38 }
 0x23b   : > { %v1871_v37 = vpack.c.bf16 %v1616_v62, %v1612_v26  ;;  %v1618_v48 = vpop.f32.mrb[43].mxu0  ;;  %v2508_v34 = vpop.f32.mrb[75].mxu1  ;;  %v2101_v12 = vadd.f32 %v2100_v3, %v2053_v39  ;;  %v1991_v61 = vunpack.c.l.bf16 %v1963_v23  ;;  %v2054_v5 = vmul.f32 %v3241_v22, %v1990_v56 }
 0x23c   : > { %v1819_v16 = vadd.f32 %v2506_v58, %v3194_v33  ;;  %v1872_v10 = vpack.c.bf16 %v1618_v48, %v1614_v51  ;;  %v2509_v29 = vadd.f32 %v2508_v34, %v2507_v7  ;;  %2098 = vadd.xlane.f32.xlu0 %v2097_v8  ;;  %v1964_v9 = vmax.bf16 %v2786_v1, %v1940_v25 }
 0x23d   : > { %v1941_v42 = vadd.bf16 %v3224_v54, %v1871_v37  ;;  %v2055_v43 = vmul.f32 %v3246_v0, %v1991_v61  ;;  %v2057_v59 = vmul.f32 %v3241_v22, %v1993_v49  ;;  %v2058_v63 = vmul.f32 %v3246_v0, %v1994_v14 }
 0x23e   : > { %v1942_v6 = vadd.bf16 %v3227_v30, %v1872_v10  ;;  %v1822_v18 = vadd.f32 %v2509_v29, %v3196_v40  ;;  %v1992_v21 = vunpack.c.l.bf16 %v1964_v9  ;;  %v1995_v31 = vunpack.c.h.bf16 %v1964_v9 }
 0x23f   : > { %v1965_v33 = vmax.bf16 %v2786_v1, %v1941_v42  ;;  %v2104_v35 = vadd.f32 %v2055_v43, %v2054_v5  ;;  %v2108_v41 = vadd.f32 %v2058_v63, %v2057_v59 }
 0x240   : > { %v1966_v50 = vmax.bf16 %v2786_v1, %v1942_v6  ;;  %v1873_v52 = vpack.c.bf16 %v1822_v18, %v1819_v16  ;;  %v2510_v4 = vpop.f32.mrb[76].mxu1  ;;  %2102 = vadd.xlane.f32.xlu0 %v2101_v12  ;;  %v1622_v19 = vpop.f32.mrb[44].mxu0  ;;  %v2056_v28 = vmul.f32 %v3249_v36, %v1992_v21  ;;  %v2059_v11 = vmul.f32 %v3249_v36, %v1995_v31 }
 0x241   : > { %v1996_v47 = vunpack.c.l.bf16 %v1965_v33  ;;  %v1999_v60 = vunpack.c.h.bf16 %v1965_v33  ;;  %v1624_v3 = vpop.f32.mrb[45].mxu0  ;;  %v2511_v40 = vpop.f32.mrb[77].mxu1 }
 0x242   : > { %v1997_v23 = vunpack.c.l.bf16 %v1966_v50  ;;  %v2000_v24 = vunpack.c.h.bf16 %v1966_v50  ;;  %v1943_v26 = vadd.bf16 %v3238_v53, %v1873_v52  ;;  %v2512_v27 = vadd.f32 %v2511_v40, %v2510_v4  ;;  %v1626_v38 = vpop.f32.mrb[46].mxu0  ;;  %v2513_v39 = vpop.f32.mrb[78].mxu1 }
 0x243   : > { %v1874_v49 = vpack.c.bf16 %v1626_v38, %v1622_v19  ;;  %v1628_v51 = vpop.f32.mrb[47].mxu0  ;;  %v2514_v45 = vpop.f32.mrb[79].mxu1  ;;  %v2105_v56 = vadd.f32 %v2104_v35, %v2056_v28  ;;  %v2109_v14 = vadd.f32 %v2108_v41, %v2059_v11  ;;  %v2063_v25 = vmul.f32 %v3241_v22, %v1999_v60 }
 0x244   : > { %v1827_v58 = vadd.f32 %v2512_v27, %v3198_v20  ;;  %v1875_v62 = vpack.c.bf16 %v1628_v51, %v1624_v3  ;;  %v2515_v7 = vadd.f32 %v2514_v45, %v2513_v39  ;;  %v1967_v8 = vmax.bf16 %v2786_v1, %v1943_v26 }
 0x245   : > { %v1944_v37 = vadd.bf16 %v3224_v54, %v1874_v49  ;;  %2106 = vadd.xlane.f32.xlu1 %v2105_v56  ;;  %v2064_v48 = vmul.f32 %v3246_v0, %v2000_v24  ;;  %v2060_v34 = vmul.f32 %v3241_v22, %v1996_v47  ;;  %v2061_v12 = vmul.f32 %v3246_v0, %v1997_v23 }
 0x246   : > { %v1945_v61 = vadd.bf16 %v3227_v30, %v1875_v62  ;;  %v1830_v5 = vadd.f32 %v2515_v7, %v3200_v55  ;;  %v2001_v16 = vunpack.c.h.bf16 %v1967_v8  ;;  %v1998_v10 = vunpack.c.l.bf16 %v1967_v8 }
 0x247   : > { %v1968_v20 = vmax.bf16 %v2786_v1, %v1944_v37  ;;  %v2116_v29 = vadd.f32 %v2064_v48, %v2063_v25  ;;  %v2112_v9 = vadd.f32 %v2061_v12, %v2060_v34 }
 0x248   : > { %v1969_v42 = vmax.bf16 %v2786_v1, %v1945_v61  ;;  %v1876_v43 = vpack.c.bf16 %v1830_v5, %v1827_v58  ;;  %v2516_v59 = vpop.f32.mrb[80].mxu1  ;;  %v1632_v63 = vpop.f32.mrb[48].mxu0  ;;  %v2065_v6 = vmul.f32 %v3249_v36, %v2001_v16  ;;  %v2062_v18 = vmul.f32 %v3249_v36, %v1998_v10 }
 0x249   : > { %v2002_v21 = vunpack.c.l.bf16 %v1968_v20  ;;  %v2005_v31 = vunpack.c.h.bf16 %v1968_v20  ;;  %2110 = vadd.xlane.f32.xlu1 %v2109_v14  ;;  %v1634_v33 = vpop.f32.mrb[49].mxu0  ;;  %v2517_v55 = vpop.f32.mrb[81].mxu1 }
 0x24a   : > { %v2003_v35 = vunpack.c.l.bf16 %v1969_v42  ;;  %v2006_v41 = vunpack.c.h.bf16 %v1969_v42  ;;  %v1946_v50 = vadd.bf16 %v3238_v53, %v1876_v43  ;;  %v2518_v52 = vadd.f32 %v2517_v55, %v2516_v59  ;;  %v1636_v4 = vpop.f32.mrb[50].mxu0  ;;  %v2519_v19 = vpop.f32.mrb[82].mxu1 }
 0x24b   : > { %v1877_v28 = vpack.c.bf16 %v1636_v4, %v1632_v63  ;;  %v1638_v11 = vpop.f32.mrb[51].mxu0  ;;  %v2520_v47 = vpop.f32.mrb[83].mxu1  ;;  %v2117_v60 = vadd.f32 %v2116_v29, %v2065_v6  ;;  %v2113_v3 = vadd.f32 %v2112_v9, %v2062_v18  ;;  %v2069_v40 = vmul.f32 %v3241_v22, %v2005_v31 }
 0x24c   : > { %v1835_v23 = vadd.f32 %v2518_v52, %v3202_v57  ;;  %v1878_v24 = vpack.c.bf16 %v1638_v11, %v1634_v33  ;;  %v2521_v26 = vadd.f32 %v2520_v47, %v2519_v19  ;;  %v1970_v27 = vmax.bf16 %v2786_v1, %v1946_v50 }
 0x24d   : > { %v1947_v38 = vadd.bf16 %v3224_v54, %v1877_v28  ;;  %2118 = vadd.xlane.f32.xlu1 %v2117_v60  ;;  %2114 = vadd.xlane.f32.xlu0 %v2113_v3  ;;  %v2070_v39 = vmul.f32 %v3246_v0, %v2006_v41  ;;  %v2066_v49 = vmul.f32 %v3241_v22, %v2002_v21 }
 0x24e   : > { %v1948_v51 = vadd.bf16 %v3227_v30, %v1878_v24  ;;  %v1838_v45 = vadd.f32 %v2521_v26, %v3204_v2  ;;  %v2007_v56 = vunpack.c.h.bf16 %v1970_v27  ;;  %v2004_v14 = vunpack.c.l.bf16 %v1970_v27 }
 0x24f   : > { %v1971_v57 = vmax.bf16 %v2786_v1, %v1947_v38  ;;  %v2124_v25 = vadd.f32 %v2070_v39, %v2069_v40  ;;  %v2067_v58 = vmul.f32 %v3246_v0, %v2003_v35 }
 0x250   : > { %v1972_v62 = vmax.bf16 %v2786_v1, %v1948_v51  ;;  %v1879_v7 = vpack.c.bf16 %v1838_v45, %v1835_v23  ;;  %v1642_v8 = vpop.f32.mrb[52].mxu0  ;;  %v2522_v37 = vpop.f32.mrb[84].mxu1  ;;  %v2071_v48 = vmul.f32 %v3249_v36, %v2007_v56  ;;  %v2068_v34 = vmul.f32 %v3249_v36, %v2004_v14 }
 0x251   : > { %v2008_v12 = vunpack.c.l.bf16 %v1971_v57  ;;  %v2011_v61 = vunpack.c.h.bf16 %v1971_v57  ;;  %v1644_v5 = vpop.f32.mrb[53].mxu0  ;;  %v2523_v2 = vpop.f32.mrb[85].mxu1  ;;  %v2120_v16 = vadd.f32 %v2067_v58, %v2066_v49 }
 0x252   : > { %v2009_v10 = vunpack.c.l.bf16 %v1972_v62  ;;  %v2012_v20 = vunpack.c.h.bf16 %v1972_v62  ;;  %v1949_v29 = vadd.bf16 %v3238_v53, %v1879_v7  ;;  %v2524_v9 = vadd.f32 %v2523_v2, %v2522_v37  ;;  %v1646_v42 = vpop.f32.mrb[54].mxu0  ;;  %v2525_v43 = vpop.f32.mrb[86].mxu1 }
 0x253   : > { %v1880_v59 = vpack.c.bf16 %v1646_v42, %v1642_v8  ;;  %v1648_v63 = vpop.f32.mrb[55].mxu0  ;;  %v2526_v6 = vpop.f32.mrb[87].mxu1  ;;  %v2125_v18 = vadd.f32 %v2124_v25, %v2071_v48  ;;  %v2121_v21 = vadd.f32 %v2120_v16, %v2068_v34  ;;  %v2075_v31 = vmul.f32 %v3241_v22, %v2011_v61 }
 0x254   : > { %v1843_v33 = vadd.f32 %v2524_v9, %v3206_v13  ;;  %v1881_v55 = vpack.c.bf16 %v1648_v63, %v1644_v5  ;;  %v2527_v35 = vadd.f32 %v2526_v6, %v2525_v43  ;;  %v1973_v41 = vmax.bf16 %v2786_v1, %v1949_v29 }
 0x255   : > { %v1950_v50 = vadd.bf16 %v3224_v54, %v1880_v59  ;;  %2126 = vadd.xlane.f32.xlu1 %v2125_v18  ;;  %2122 = vadd.xlane.f32.xlu0 %v2121_v21  ;;  %v2076_v52 = vmul.f32 %v3246_v0, %v2012_v20  ;;  %v2072_v4 = vmul.f32 %v3241_v22, %v2008_v12 }
 0x256   : > { %v1951_v19 = vadd.bf16 %v3227_v30, %v1881_v55  ;;  %v1846_v28 = vadd.f32 %v2527_v35, %v3208_v44  ;;  %v2013_v11 = vunpack.c.h.bf16 %v1973_v41  ;;  %v2010_v47 = vunpack.c.l.bf16 %v1973_v41 }
 0x257   : > { %v1974_v13 = vmax.bf16 %v2786_v1, %v1950_v50  ;;  %v2132_v60 = vadd.f32 %v2076_v52, %v2075_v31  ;;  %v2073_v3 = vmul.f32 %v3246_v0, %v2009_v10 }
 0x258   : > { %v1975_v40 = vmax.bf16 %v2786_v1, %v1951_v19  ;;  %v1882_v23 = vpack.c.bf16 %v1846_v28, %v1843_v33  ;;  %v1652_v24 = vpop.f32.mrb[56].mxu0  ;;  %v2528_v26 = vpop.f32.mrb[88].mxu1  ;;  %v2077_v27 = vmul.f32 %v3249_v36, %v2013_v11  ;;  %v2074_v38 = vmul.f32 %v3249_v36, %v2010_v47 }
 0x259   : > { %v2014_v39 = vunpack.c.l.bf16 %v1974_v13  ;;  %v2017_v49 = vunpack.c.h.bf16 %v1974_v13  ;;  %v1654_v51 = vpop.f32.mrb[57].mxu0  ;;  %v2529_v44 = vpop.f32.mrb[89].mxu1  ;;  %v2128_v45 = vadd.f32 %v2073_v3, %v2072_v4 }
 0x25a   : > { %v2015_v56 = vunpack.c.l.bf16 %v1975_v40  ;;  %v2018_v14 = vunpack.c.h.bf16 %v1975_v40  ;;  %v1952_v57 = vadd.bf16 %v3238_v53, %v1882_v23  ;;  %v2530_v25 = vadd.f32 %v2529_v44, %v2528_v26  ;;  %v1656_v58 = vpop.f32.mrb[58].mxu0  ;;  %v2531_v62 = vpop.f32.mrb[90].mxu1 }
 0x25b   : > { %v1883_v7 = vpack.c.bf16 %v1656_v58, %v1652_v24  ;;  %v1658_v8 = vpop.f32.mrb[59].mxu0  ;;  %v2532_v37 = vpop.f32.mrb[91].mxu1  ;;  %v2133_v48 = vadd.f32 %v2132_v60, %v2077_v27  ;;  %v2129_v34 = vadd.f32 %v2128_v45, %v2074_v38  ;;  %v2081_v12 = vmul.f32 %v3241_v22, %v2017_v49 }
 0x25c   : > { %v1851_v61 = vadd.f32 %v2530_v25, %v3210_v17  ;;  %v1884_v5 = vpack.c.bf16 %v1658_v8, %v1654_v51  ;;  %v2533_v2 = vadd.f32 %v2532_v37, %v2531_v62  ;;  %v1976_v16 = vmax.bf16 %v2786_v1, %v1952_v57 }
 0x25d   : > { %v1953_v10 = vadd.bf16 %v3224_v54, %v1883_v7  ;;  %2134 = vadd.xlane.f32.xlu1 %v2133_v48  ;;  %2130 = vadd.xlane.f32.xlu0 %v2129_v34  ;;  %v2082_v20 = vmul.f32 %v3246_v0, %v2018_v14  ;;  %v2078_v29 = vmul.f32 %v3241_v22, %v2014_v39 }
 0x25e   : > { %v1954_v9 = vadd.bf16 %v3227_v30, %v1884_v5  ;;  %v1854_v42 = vadd.f32 %v2533_v2, %v3215_v32  ;;  %v2019_v43 = vunpack.c.h.bf16 %v1976_v16  ;;  %v2016_v59 = vunpack.c.l.bf16 %v1976_v16 }
 0x25f   : > { %v1977_v17 = vmax.bf16 %v2786_v1, %v1953_v10  ;;  %v2140_v63 = vadd.f32 %v2082_v20, %v2081_v12  ;;  %v2079_v6 = vmul.f32 %v3246_v0, %v2015_v56 }
 0x260   : > { %v1978_v18 = vmax.bf16 %v2786_v1, %v1954_v9  ;;  %v1885_v21 = vpack.c.bf16 %v1854_v42, %v1851_v61  ;;  %v1662_v31 = vpop.f32.mrb[60].mxu0  ;;  %v2534_v33 = vpop.f32.mrb[92].mxu1  ;;  %v2083_v55 = vmul.f32 %v3249_v36, %v2019_v43  ;;  %v2080_v35 = vmul.f32 %v3249_v36, %v2016_v59 }
 0x261   : > { %v2020_v41 = vunpack.c.l.bf16 %v1977_v17  ;;  %v2023_v50 = vunpack.c.h.bf16 %v1977_v17  ;;  %v1664_v52 = vpop.f32.mrb[61].mxu0  ;;  %v2535_v32 = vpop.f32.mrb[93].mxu1  ;;  %v2136_v4 = vadd.f32 %v2079_v6, %v2078_v29 }
 0x262   : > { %v2021_v19 = vunpack.c.l.bf16 %v1978_v18  ;;  %v2024_v28 = vunpack.c.h.bf16 %v1978_v18  ;;  %v1955_v11 = vadd.bf16 %v3238_v53, %v1885_v21  ;;  %v2536_v47 = vadd.f32 %v2535_v32, %v2534_v33  ;;  %v1666_v13 = vpop.f32.mrb[62].mxu0  ;;  %v2537_v60 = vpop.f32.mrb[94].mxu1 }
 0x263   : > { %v1886_v3 = vpack.c.bf16 %v1666_v13, %v1662_v31  ;;  %v1668_v40 = vpop.f32.mrb[63].mxu0  ;;  %v2538_v23 = vpop.f32.mrb[95].mxu1  ;;  %v2141_v24 = vadd.f32 %v2140_v63, %v2083_v55  ;;  %v2137_v26 = vadd.f32 %v2136_v4, %v2080_v35  ;;  %v2087_v27 = vmul.f32 %v3241_v22, %v2023_v50 }
 0x264   : > { %v1859_v38 = vadd.f32 %v2536_v47, %v3218_v46  ;;  %v1887_v39 = vpack.c.bf16 %v1668_v40, %v1664_v52  ;;  %v2539_v49 = vadd.f32 %v2538_v23, %v2537_v60  ;;  %v1979_v51 = vmax.bf16 %v2786_v1, %v1955_v11 }
 0x265   : > { %v1956_v44 = vadd.bf16 %v3224_v54, %v1886_v3  ;;  %2142 = vadd.xlane.f32.xlu1 %v2141_v24  ;;  %2138 = vadd.xlane.f32.xlu0 %v2137_v26  ;;  %v2088_v45 = vmul.f32 %v3246_v0, %v2024_v28  ;;  %v2084_v56 = vmul.f32 %v3241_v22, %v2020_v41 }
 0x266   : > { %v1957_v14 = vadd.bf16 %v3227_v30, %v1887_v39  ;;  %v1862_v57 = vadd.f32 %v2539_v49, %v3221_v15  ;;  %v2025_v25 = vunpack.c.h.bf16 %v1979_v51  ;;  %v2022_v58 = vunpack.c.l.bf16 %v1979_v51 }
 0x267   : > { %v1980_v46 = vmax.bf16 %v2786_v1, %v1956_v44  ;;  %v2148_v62 = vadd.f32 %v2088_v45, %v2087_v27  ;;  %v2085_v7 = vmul.f32 %v3246_v0, %v2021_v19 }
 0x268   : > { %v1981_v8 = vmax.bf16 %v2786_v1, %v1957_v14  ;;  %v1888_v54 = vpack.c.bf16 %v1862_v57, %v1859_v38  ;;  %v2089_v37 = vmul.f32 %v3249_v36, %v2025_v25  ;;  %v2086_v48 = vmul.f32 %v3249_v36, %v2022_v58 }
 0x269   : > { %v2026_v34 = vunpack.c.l.bf16 %v1980_v46  ;;  %v2029_v12 = vunpack.c.h.bf16 %v1980_v46  ;;  %v2144_v61 = vadd.f32 %v2085_v7, %v2084_v56 }
 0x26a   : > { %v2027_v30 = vunpack.c.l.bf16 %v1981_v8  ;;  %v2030_v5 = vunpack.c.h.bf16 %v1981_v8  ;;  %v1958_v15 = vadd.bf16 %v3238_v53, %v1888_v54  ;;  %v2149_v2 = vadd.f32 %v2148_v62, %v2089_v37 }
 0x26b   : > { %v2145_v16 = vadd.f32 %v2144_v61, %v2086_v48  ;;  %v2093_v10 = vmul.f32 %v3241_v22, %v2029_v12  ;;  %v2090_v20 = vmul.f32 %v3241_v22, %v2026_v34  ;;  %v2409_v22 = vld [vmem:[#allocation2] ss:$0 sm:$0xff] }
 0x26c   : > { %2150 = vadd.xlane.f32.xlu1 %v2149_v2  ;;  %v1982_v29 = vmax.bf16 %v2786_v1, %v1958_v15  ;;  %v2094_v9 = vmul.f32 %v3246_v0, %v2030_v5  ;;  %v2091_v42 = vmul.f32 %v3246_v0, %v2027_v30 }
 0x26d   : > { %2146 = vadd.xlane.f32.xlu0 %v2145_v16 }
 0x26e   : > { %v2031_v43 = vunpack.c.h.bf16 %v1982_v29  ;;  %v2156_v59 = vadd.f32 %v2094_v9, %v2093_v10  ;;  %v2028_v17 = vunpack.c.l.bf16 %v1982_v29  ;;  %v2152_v63 = vadd.f32 %v2091_v42, %v2090_v20 }
 0x270   : > { %v2095_v53 = vmul.f32 %v3249_v36, %v2031_v43  ;;  %v2092_v6 = vmul.f32 %v3249_v36, %v2028_v17 }
 0x272   : > { %v2157_v18 = vadd.f32 %v2156_v59, %v2095_v53  ;;  %v2153_v21 = vadd.f32 %v2152_v63, %v2092_v6 }
 0x274   : > { %2158 = vadd.xlane.f32.xlu1 %v2157_v18  ;;  %2154 = vadd.xlane.f32.xlu0 %v2153_v21 }
 0x2c9   : > { %v2099_v1 = vpop.xlane.xlu0 %2098 }
 0x2ca   : > { %v2167_v0 = vadd.f32 %v2409_v22, %v2099_v1 }
 0x2cc   : > { %2184 = vst.msk [vmem:[%s3360_s6] sm:$0xff] %vm2183_vm1, %v2167_v0 }
 0x2cd   : > { %v2103_v36 = vpop.xlane.xlu0 %2102 }
 0x2ce   : > { %v2168_v31 = vadd.f32 %v2409_v22, %v2103_v36 }
 0x2d0   : > { %2185 = vst.msk [vmem:[%s3360_s6 + $0x8] sm:$0xff] %vm2183_vm1, %v2168_v31 }
 0x2d2   : > { %v2107_v33 = vpop.xlane.xlu1 %2106 }
 0x2d3   : > { %v2169_v55 = vadd.f32 %v2409_v22, %v2107_v33 }
 0x2d5   : > { %2186 = vst.msk [vmem:[%s3360_s6 + $0x10] sm:$0xff] %vm2183_vm1, %v2169_v55 }
 0x2d6   : > { %v2111_v35 = vpop.xlane.xlu1 %2110 }
 0x2d7   : > { %v2170_v41 = vadd.f32 %v2409_v22, %v2111_v35 }
 0x2d9   : > { %2187 = vst.msk [vmem:[%s3360_s6 + $0x18] sm:$0xff] %vm2183_vm1, %v2170_v41 }
 0x2da   : > { %v2119_v50 = vpop.xlane.xlu1 %2118  ;;  %v2115_v52 = vpop.xlane.xlu0 %2114 }
 0x2db   : > { %v2172_v32 = vadd.f32 %v2409_v22, %v2119_v50  ;;  %v2171_v4 = vadd.f32 %v2409_v22, %v2115_v52 }
 0x2dd   : > { %2189 = vst.msk [vmem:[%s3360_s6 + $0x28] sm:$0xff] %vm2183_vm1, %v2172_v32  ;;  %2188 = vst.msk [vmem:[%s3360_s6 + $0x20] sm:$0xff] %vm2183_vm1, %v2171_v4 }
 0x2e2   : > { %v2127_v19 = vpop.xlane.xlu1 %2126  ;;  %v2123_v28 = vpop.xlane.xlu0 %2122 }
 0x2e3   : > { %v2174_v11 = vadd.f32 %v2409_v22, %v2127_v19  ;;  %v2173_v47 = vadd.f32 %v2409_v22, %v2123_v28 }
 0x2e5   : > { %2191 = vst.msk [vmem:[%s3360_s6 + $0x38] sm:$0xff] %vm2183_vm1, %v2174_v11  ;;  %2190 = vst.msk [vmem:[%s3360_s6 + $0x30] sm:$0xff] %vm2183_vm1, %v2173_v47 }
 0x2ea   : > { %v2135_v13 = vpop.xlane.xlu1 %2134  ;;  %v2131_v60 = vpop.xlane.xlu0 %2130 }
 0x2eb   : > { %v2176_v3 = vadd.f32 %v2409_v22, %v2135_v13  ;;  %v2175_v40 = vadd.f32 %v2409_v22, %v2131_v60 }
 0x2ed   : > { %2193 = vst.msk [vmem:[%s3360_s6 + $0x48] sm:$0xff] %vm2183_vm1, %v2176_v3  ;;  %2192 = vst.msk [vmem:[%s3360_s6 + $0x40] sm:$0xff] %vm2183_vm1, %v2175_v40 }
 0x2f2   : > { %v2143_v23 = vpop.xlane.xlu1 %2142  ;;  %v2139_v24 = vpop.xlane.xlu0 %2138 }
 0x2f3   : > { %v2178_v26 = vadd.f32 %v2409_v22, %v2143_v23  ;;  %v2177_v27 = vadd.f32 %v2409_v22, %v2139_v24 }
 0x2f5   : > { %2195 = vst.msk [vmem:[%s3360_s6 + $0x58] sm:$0xff] %vm2183_vm1, %v2178_v26  ;;  %2194 = vst.msk [vmem:[%s3360_s6 + $0x50] sm:$0xff] %vm2183_vm1, %v2177_v27 }
 0x2f9   : > { %v2151_v38 = vpop.xlane.xlu1 %2150 }
 0x2fa   : > { %v2180_v39 = vadd.f32 %v2409_v22, %v2151_v38  ;;  %v2147_v49 = vpop.xlane.xlu0 %2146 }
 0x2fb   : > { %v2179_v51 = vadd.f32 %v2409_v22, %v2147_v49 }
 0x2fc   : > { %2197 = vst.msk [vmem:[%s3360_s6 + $0x68] sm:$0xff] %vm2183_vm1, %v2180_v39 }
 0x2fd   : > { %2196 = vst.msk [vmem:[%s3360_s6 + $0x60] sm:$0xff] %vm2183_vm1, %v2179_v51 }
 0x301   : > { %v2159_v44 = vpop.xlane.xlu1 %2158  ;;  %v2155_v45 = vpop.xlane.xlu0 %2154 }
 0x302   : > { %v2182_v56 = vadd.f32 %v2409_v22, %v2159_v44  ;;  %v2181_v14 = vadd.f32 %v2409_v22, %v2155_v45 }
 0x304   : > { %2199 = vst.msk [vmem:[%s3360_s6 + $0x78] sm:$0xff] %vm2183_vm1, %v2182_v56  ;;  %2198 = vst.msk [vmem:[%s3360_s6 + $0x70] sm:$0xff] %vm2183_vm1, %v2181_v14 }
 0x305 PF: > { %s20_s26 = sadd.s32 1, %s2781_s26  }
 0x306   : > { %p17_p3 = scmp.ge.s32.totalorder %s20_s26, 4  }
 0x308   :  { %19 = sbr.rel (!%p17_p3) target bundleno = 4 (0x4), region = 83 }
 0x30f   :  { %2222 = vsyncpa [#allocation4], 1 }
 0x310   :  { %2224 = vsyncpa [#allocation4 + $0x1], 1 }

</bundles_post_ra>
